<compile_context>
chip_gen: v7x
topology: tpu7x:2x2x1
jax: 0.10.0
libtpu: 0.0.40
codegen_flags: <defaults>
</compile_context>

<pallas_src>
from functools import partial

import numpy as np
import jax
import jax.numpy as jnp
from jax import lax
from jax.experimental import pallas as pl
from jax.experimental.pallas import tpu as pltpu


def _round_up(n, m):
    return ((n + m - 1) // m) * m


# Constant expansion matrix E[j, 3j + k] = 1 so that
#   x.view(B, 22, 3) * jw[..., None]  ==  x * (jw @ E)      (MXU-friendly)
# Built once at import time (hoisted out of the per-step call path).
_EXPAND_22_TO_66 = np.kron(np.eye(22, dtype=np.float32),
                           np.ones((1, 3), dtype=np.float32))


def streaming_sight_mu_kernel(
    x_ref, expand_ref, h_ref, biases_ref,
    ja1_w_ref, ja2_w_ref, inp_w_ref,
    wx_ref, bx_ref, wh_ref, ch_ref,
    res_w_ref, res_b_ref,
    out_w_ref, fc_w_ref,
    logp_ref, newh_ref,
):
    f32 = jnp.float32

    def dot(a, b):
        # Weights may arrive as bf16 (halves the dominant HBM->VMEM weight DMA);
        # activations stay f32 (v5e has no bf16 VPU/EUP path), so the weight
        # operand is widened just before the MXU.  f32 accumulation throughout.
        return jnp.dot(a, b.astype(f32), preferred_element_type=f32)

    def sigmoid(z):
        # 1/(1+exp(-z)) == 0.5*tanh(0.5*z) + 0.5 : single EUP op, no divide chain.
        return 0.5 * jnp.tanh(0.5 * z) + 0.5

    L, _, H = h_ref.shape
    HA = ja1_w_ref.shape[1]            # hidden_size // 2
    NJ = ja2_w_ref.shape[1]            # 22 joints
    # Packed-bias segment offsets (mirror prepare_params; every offset 128-aligned).
    o_ja2 = _round_up(HA, 128)
    o_inp = o_ja2 + _round_up(NJ, 128)
    o_out = o_inp + H
    o_fc = o_out + H

    x = x_ref[...]                                              # [TB, D]

    # ---- joint attention: Linear -> ReLU -> Linear -> softmax ----
    a1 = jnp.maximum(dot(x, ja1_w_ref[...]) + biases_ref[:, :HA], 0.0)
    jl = dot(a1, ja2_w_ref[...]) + biases_ref[:, o_ja2:o_ja2 + NJ]   # [TB, 22]
    je = jnp.exp(jl - jnp.max(jl, axis=-1, keepdims=True))
    jw = je * pl.reciprocal(jnp.sum(je, axis=-1, keepdims=True), approx=True)

    # x.view(B, 22, 3) * jw[..., None]  ==  x * (jw @ E)
    xw = x * dot(jw, expand_ref[...])                           # [TB, D]

    # ---- input projection ----
    cur = dot(xw, inp_w_ref[...]) + biases_ref[:, o_inp:o_inp + H]   # [TB, H]

    # ---- stacked GRU-like layers (fused gates: 3 matmuls per layer) ----
    def layer(i, cur, *, last):
        h_i = h_ref[i]                                          # [TB, H]
        gx = dot(cur, wx_ref[i]) + bx_ref[i]                    # [TB, 3H]  u|r|c (x path)
        gh = dot(h_i, wh_ref[i])                                # [TB, 2H]  u|r   (h path)
        u = sigmoid(gx[:, :H] + gh[:, :H])
        r = sigmoid(gx[:, H:2 * H] + gh[:, H:])
        c = jnp.tanh(gx[:, 2 * H:] + dot(r * h_i, ch_ref[i]))
        nh = (1.0 - u) * h_i + u * c                            # dropout = identity (eval)
        newh_ref[i] = nh
        if last:
            return nh
        return cur + dot(nh, res_w_ref[i]) + res_b_ref[i]

    # Layers 0..L-2 carry a residual projection back into `cur`; the last layer
    # replaces it.  fori_loop (unrolled for small L) bounds vreg live ranges per
    # layer instead of keeping all L layers' intermediates live at once.
    if L > 1:
        cur = lax.fori_loop(0, L - 1, lambda i, c: layer(i, c, last=False), cur,
                            unroll=(L <= 4))
    cur = layer(L - 1, cur, last=True)

    # ---- output head: Linear -> ReLU -> Linear -> log_softmax (kept exact) ----
    o = jnp.maximum(dot(cur, out_w_ref[...]) + biases_ref[:, o_out:o_out + H], 0.0)
    logits = dot(o, fc_w_ref[...]) + biases_ref[:, o_fc:]       # [TB, O_pad]
    m = jnp.max(logits, axis=-1, keepdims=True)
    lse = m + jnp.log(jnp.sum(jnp.exp(logits - m), axis=-1, keepdims=True))
    logp_ref[...] = logits - lse


def prepare_params(params, weight_dtype=jnp.bfloat16):
    """One-time repack (call once, outside the streaming loop):
      - fuse the per-layer gate weights (wx/wh/ch),
      - store all weight matrices as `weight_dtype` (bf16 default: halves HBM DMA
        and VMEM; pass jnp.float32 for exact f32 parity),
      - pad the classifier head to a lane-dense (multiple-of-128) width,
      - pack the small per-call bias rows into one lane-aligned array (fewer DMAs).
    """
    H = params["inp_w"].shape[-1]
    O = params["fc_w"].shape[-1]
    L = params["upd_w"].shape[0]
    assert H % 128 == 0, "hidden_size must be a multiple of 128 (lane-aligned gate slices)"
    assert O >= 1, "output_dim must be >= 1 (padded fc logits use a -1e30 bias)"
    O_pad = _round_up(O, 128)
    HA = H // 2
    NJ = params["ja2_w"].shape[-1]

    wcast = lambda a: jnp.asarray(a, weight_dtype)

    # Packed biases: [ ja1_b | ja2_b | inp_b | out_b | fc_b ], 128-aligned segments.
    o_ja2 = _round_up(HA, 128)
    o_inp = o_ja2 + _round_up(NJ, 128)
    o_out = o_inp + H
    o_fc = o_out + H
    biases = jnp.zeros((1, o_fc + O_pad), jnp.float32)
    biases = biases.at[:, :HA].set(params["ja1_b"])
    biases = biases.at[:, o_ja2:o_ja2 + NJ].set(params["ja2_b"])
    biases = biases.at[:, o_inp:o_inp + H].set(params["inp_b"])
    biases = biases.at[:, o_out:o_out + H].set(params["out_b"])
    biases = biases.at[:, o_fc:].set(-1e30)          # padded logits never win the log-softmax
    biases = biases.at[:, o_fc:o_fc + O].set(params["fc_b"])

    res_w, res_b = params["res_w"], params["res_b"]
    if L == 1:   # keep operands non-empty for pallas_call; never read in-kernel
        res_w = jnp.zeros((1, H, H), jnp.float32)
        res_b = jnp.zeros((1, 1, H), jnp.float32)

    fc_w = jnp.zeros((H, O_pad), jnp.float32).at[:, :O].set(params["fc_w"])

    packed = {
        "expand": jnp.asarray(_EXPAND_22_TO_66),
        "biases": biases,
        "ja1_w": wcast(params["ja1_w"]), "ja2_w": wcast(params["ja2_w"]),
        "inp_w": wcast(params["inp_w"]),
        "wx": wcast(jnp.concatenate([params["upd_w"][:, :H, :],
                                     params["rst_w"][:, :H, :],
                                     params["cand_w"][:, :H, :]], axis=-1)),   # [L, H, 3H]
        "bx": jnp.concatenate([params["upd_b"], params["rst_b"],
                               params["cand_b"]], axis=-1),                    # [L, 1, 3H]
        "wh": wcast(jnp.concatenate([params["upd_w"][:, H:, :],
                                     params["rst_w"][:, H:, :]], axis=-1)),    # [L, H, 2H]
        "ch": wcast(params["cand_w"][:, H:, :]),                               # [L, H, H]
        "res_w": wcast(res_w), "res_b": res_b,
        "out_w": wcast(params["out_w"]),
        "fc_w": wcast(fc_w),
    }
    return packed, O


def _full_spec(a):
    nd = a.ndim
    return pl.BlockSpec(a.shape, lambda b, _nd=nd: (0,) * _nd)


@partial(jax.jit, static_argnames=("out_dim", "batch_tile"), donate_argnames=("h",))
def streaming_sight_mu(x, h, packed, *, out_dim, batch_tile=128):
    """x: [B, 1, D]; h: [L, B, H] (donated, updated in place);
    returns (log_probs [B, out_dim], new_h [L, B, H]).

    Tiling: one grid step handles up to `batch_tile` rows (default 128, which fills
    the MXU rows on every matmul); the grid only splits batches larger than that.
    On v6e/v7x with big batches, batch_tile=256 fills the 256-row MXU.
    """
    B, S, D = x.shape
    assert S == 1 and D == 66, "StreamingSightMu expects seq_len=1, input_dim=66 (22 joints x 3)"
    L, _, H = h.shape
    O_pad = packed["fc_w"].shape[-1]
    TB = min(batch_tile, B)
    assert B % TB == 0, "batch must be divisible by the batch tile (pass batch_tile explicitly)"
    x2d = x.reshape(B, D)

    args = (
        x2d, packed["expand"], h, packed["biases"],
        packed["ja1_w"], packed["ja2_w"], packed["inp_w"],
        packed["wx"], packed["bx"], packed["wh"], packed["ch"],
        packed["res_w"], packed["res_b"],
        packed["out_w"], packed["fc_w"],
    )

    in_specs = [
        pl.BlockSpec((TB, D), lambda b: (b, 0)),        # x      : batch-tiled
        _full_spec(packed["expand"]),                   # expand : resident
        pl.BlockSpec((L, TB, H), lambda b: (0, b, 0)),  # h      : batch-tiled
    ] + [_full_spec(a) for a in args[3:]]               # weights/biases: resident in VMEM
    # NOTE: with f32 weights at very large H/L (e.g. H=512, L=6 on v7x's 64 MiB VMEM),
    # stream per-layer gate weights via a grid axis over L instead of keeping them all
    # resident; bf16 storage (default) keeps H=512/L=6 at ~22 MiB, comfortably resident.
    # NOTE: if the grid is > 1 and the lowering double-buffers these constant blocks,
    # add pipeline_mode=pl.Buffered(1) to the weight specs to halve their footprint.

    out_specs = (
        pl.BlockSpec((TB, O_pad), lambda b: (b, 0)),    # lane-dense padded log-probs
        pl.BlockSpec((L, TB, H), lambda b: (0, b, 0)),  # new_h (aliased onto h)
    )

    # Explicit VMEM budget: resident weights (single copy) + double-buffered batch
    # tiles + activation headroom.  Raising above the 16/32 MiB scoped defaults avoids
    # surprise OOM when H/L scale up; capped well below physical VMEM.
    resident = sum(int(np.prod(a.shape)) * a.dtype.itemsize
                   for i, a in enumerate(args) if i not in (0, 2))
    tiled = 2 * 4 * (TB * D + 2 * L * TB * H + TB * O_pad)
    headroom = 32 * TB * max(H, 128) * 4 + (2 << 20)
    vmem_limit = int(min(max(resident + tiled + headroom, 32 << 20), 112 << 20))

    grid = (B // TB,)
    # Only request parallel (cross-core on v7x) scheduling when each tile keeps the
    # MXU rows full; splitting a tiny-M problem per core just duplicates overhead.
    dim_sem = ("parallel",) if TB >= 128 else ("arbitrary",)

    logp_pad, new_h = pl.pallas_call(
        streaming_sight_mu_kernel,
        out_shape=(
            jax.ShapeDtypeStruct((B, O_pad), jnp.float32),
            jax.ShapeDtypeStruct((L, B, H), jnp.float32),
        ),
        grid_spec=pltpu.PrefetchScalarGridSpec(
            num_scalar_prefetch=0,
            grid=grid,
            in_specs=in_specs,
            out_specs=out_specs,
        ),
        input_output_aliases={2: 1},                    # new_h overwrites h in place
        compiler_params=pltpu.CompilerParams(
            dimension_semantics=dim_sem,
            vmem_limit_bytes=vmem_limit,
        ),
    )(*args)
    return logp_pad[:, :out_dim], new_h


def reference_forward(x, h, params):
    """Pure-JAX reference mirroring the PyTorch forward (eval mode, unfused weights)."""
    B, S, D = x.shape
    x = x.reshape(B, D)
    a1 = jax.nn.relu(x @ params["ja1_w"] + params["ja1_b"])
    jw = jax.nn.softmax(a1 @ params["ja2_w"] + params["ja2_b"], axis=-1)
    xw = (x.reshape(B, 22, 3) * jw[..., None]).reshape(B, D)
    cur = xw @ params["inp_w"] + params["inp_b"]
    L = h.shape[0]
    new_h = []
    for i in range(L):
        h_i = h[i]
        comb = jnp.concatenate([cur, h_i], axis=-1)
        u = jax.nn.sigmoid(comb @ params["upd_w"][i] + params["upd_b"][i])
        r = jax.nn.sigmoid(comb @ params["rst_w"][i] + params["rst_b"][i])
        cand_in = jnp.concatenate([cur, r * h_i], axis=-1)
        c = jnp.tanh(cand_in @ params["cand_w"][i] + params["cand_b"][i])
        nh = (1 - u) * h_i + u * c
        new_h.append(nh)
        if i < L - 1:
            cur = cur + nh @ params["res_w"][i] + params["res_b"][i]
        else:
            cur = nh
    o = jax.nn.relu(cur @ params["out_w"] + params["out_b"])
    logits = o @ params["fc_w"] + params["fc_b"]
    return jax.nn.log_softmax(logits, axis=-1), jnp.stack(new_h)


def init_params(key, input_dim, output_dim, hidden_size, num_layers):
    ks = jax.random.split(key, 32)
    s = 0.1
    H, D, O, L = hidden_size, input_dim, output_dim, num_layers
    return {
        "ja1_w": jax.random.normal(ks[0], (D, H // 2), jnp.float32) * s,
        "ja1_b": jax.random.normal(ks[1], (1, H // 2), jnp.float32) * s,
        "ja2_w": jax.random.normal(ks[2], (H // 2, 22), jnp.float32) * s,
        "ja2_b": jax.random.normal(ks[3], (1, 22), jnp.float32) * s,
        "inp_w": jax.random.normal(ks[4], (D, H), jnp.float32) * s,
        "inp_b": jax.random.normal(ks[5], (1, H), jnp.float32) * s,
        "upd_w": jax.random.normal(ks[6], (L, 2 * H, H), jnp.float32) * s,
        "upd_b": jax.random.normal(ks[7], (L, 1, H), jnp.float32) * s,
        "rst_w": jax.random.normal(ks[8], (L, 2 * H, H), jnp.float32) * s,
        "rst_b": jax.random.normal(ks[9], (L, 1, H), jnp.float32) * s,
        "cand_w": jax.random.normal(ks[10], (L, 2 * H, H), jnp.float32) * s,
        "cand_b": jax.random.normal(ks[11], (L, 1, H), jnp.float32) * s,
        "res_w": jax.random.normal(ks[12], (L - 1, H, H), jnp.float32) * s,
        "res_b": jax.random.normal(ks[13], (L - 1, 1, H), jnp.float32) * s,
        "out_w": jax.random.normal(ks[14], (H, H), jnp.float32) * s,
        "out_b": jax.random.normal(ks[15], (1, H), jnp.float32) * s,
        "fc_w": jax.random.normal(ks[16], (H, O), jnp.float32) * s,
        "fc_b": jax.random.normal(ks[17], (1, O), jnp.float32) * s,
    }


_WEIGHT_KEYS = ("ja1_w", "ja2_w", "inp_w", "upd_w", "rst_w", "cand_w",
                "res_w", "out_w", "fc_w")


def bf16_round_weights(params):
    """Round weight matrices through bf16 (the kernel's storage dtype) so a pure-f32
    reference computed from these values matches the kernel tightly."""
    return {k: (jnp.asarray(v, jnp.bfloat16).astype(jnp.float32) if k in _WEIGHT_KEYS else v)
            for k, v in params.items()}


if __name__ == "__main__":
    B = 16            # multiple streams batched per step (fills sublanes / MXU rows)
    D = 66            # input_dim = 22 joints * 3 coords (required by view(B,22,3))
    H = 128           # hidden_size (small, lane-aligned test size)
    L = 3             # num_layers (small test size)
    O = 16            # output_dim

    key = jax.random.PRNGKey(0)
    kx, kh, kp = jax.random.split(key, 3)
    x = jax.random.normal(kx, (B, 1, D), jnp.float32)
    h = jax.random.normal(kh, (L, B, H), jnp.float32)
    params = init_params(kp, D, O, H, L)

    # Weights are stored bf16 inside the kernel; build the reference from the same
    # bf16-rounded values so the comparison isolates kernel correctness.
    params_q = bf16_round_weights(params)

    # Reference first: h is donated to the kernel call below.
    ref_logp, ref_new_h = reference_forward(x, h, params_q)
    ref_logp, ref_new_h = jax.block_until_ready((ref_logp, ref_new_h))

    packed, out_dim = prepare_params(params_q)   # lossless: values already bf16-representable
    logp, new_h = streaming_sight_mu(x, h, packed, out_dim=out_dim)
    jax.block_until_ready((logp, new_h))

    # Slightly relaxed tolerance: in-kernel softmax uses the EUP approx reciprocal.
    np.testing.assert_allclose(np.asarray(logp), np.asarray(ref_logp), rtol=2e-3, atol=2e-3)
    np.testing.assert_allclose(np.asarray(new_h), np.asarray(ref_new_h), rtol=2e-3, atol=2e-3)

    print("KERNEL_OK")
</pallas_src>

<mosaic_0001>
module attributes {stable_mosaic.version = 11 : i64} {
  func.func @streaming_sight_mu_kernel(%arg0: i32, %arg1: memref<16x66xf32, #tpu.memory_space<vmem>>, %arg2: memref<22x66xf32, #tpu.memory_space<vmem>>, %arg3: memref<3x16x128xf32, #tpu.memory_space<vmem>>, %arg4: memref<1x640xf32, #tpu.memory_space<vmem>>, %arg5: memref<66x64xbf16, #tpu.memory_space<vmem>>, %arg6: memref<64x22xbf16, #tpu.memory_space<vmem>>, %arg7: memref<66x128xbf16, #tpu.memory_space<vmem>>, %arg8: memref<3x128x384xbf16, #tpu.memory_space<vmem>>, %arg9: memref<3x1x384xf32, #tpu.memory_space<vmem>>, %arg10: memref<3x128x256xbf16, #tpu.memory_space<vmem>>, %arg11: memref<3x128x128xbf16, #tpu.memory_space<vmem>>, %arg12: memref<2x128x128xbf16, #tpu.memory_space<vmem>>, %arg13: memref<2x1x128xf32, #tpu.memory_space<vmem>>, %arg14: memref<128x128xbf16, #tpu.memory_space<vmem>>, %arg15: memref<128x128xbf16, #tpu.memory_space<vmem>>, %arg16: memref<16x128xf32, #tpu.memory_space<vmem>>, %arg17: memref<3x16x128xf32, #tpu.memory_space<vmem>>) attributes {dimension_semantics = [#tpu.dimension_semantics<arbitrary>], iteration_bounds = array<i64: 1>, scalar_prefetch = 0 : i64, scratch_operands = 0 : i64, tpu.core_type = #tpu.core_type<tc>, window_params = [{transform_indices = @transform_0, window_bounds = array<i64: 16, 66>}, {pipeline_mode = #tpu.pipeline_mode<synchronous>, transform_indices = @transform_1, window_bounds = array<i64: 22, 66>}, {transform_indices = @transform_2, window_bounds = array<i64: 3, 16, 128>}, {pipeline_mode = #tpu.pipeline_mode<synchronous>, transform_indices = @transform_3, window_bounds = array<i64: 1, 640>}, {pipeline_mode = #tpu.pipeline_mode<synchronous>, transform_indices = @transform_4, window_bounds = array<i64: 66, 64>}, {pipeline_mode = #tpu.pipeline_mode<synchronous>, transform_indices = @transform_5, window_bounds = array<i64: 64, 22>}, {pipeline_mode = #tpu.pipeline_mode<synchronous>, transform_indices = @transform_6, window_bounds = array<i64: 66, 128>}, {pipeline_mode = #tpu.pipeline_mode<synchronous>, transform_indices = @transform_7, window_bounds = array<i64: 3, 128, 384>}, {pipeline_mode = #tpu.pipeline_mode<synchronous>, transform_indices = @transform_8, window_bounds = array<i64: 3, 1, 384>}, {pipeline_mode = #tpu.pipeline_mode<synchronous>, transform_indices = @transform_9, window_bounds = array<i64: 3, 128, 256>}, {pipeline_mode = #tpu.pipeline_mode<synchronous>, transform_indices = @transform_10, window_bounds = array<i64: 3, 128, 128>}, {pipeline_mode = #tpu.pipeline_mode<synchronous>, transform_indices = @transform_11, window_bounds = array<i64: 2, 128, 128>}, {pipeline_mode = #tpu.pipeline_mode<synchronous>, transform_indices = @transform_12, window_bounds = array<i64: 2, 1, 128>}, {pipeline_mode = #tpu.pipeline_mode<synchronous>, transform_indices = @transform_13, window_bounds = array<i64: 128, 128>}, {pipeline_mode = #tpu.pipeline_mode<synchronous>, transform_indices = @transform_14, window_bounds = array<i64: 128, 128>}, {transform_indices = @transform_15, window_bounds = array<i64: 16, 128>}, {transform_indices = @transform_16, window_bounds = array<i64: 3, 16, 128>}]} {
    %c0 = arith.constant 0 : index
    %c0_0 = arith.constant 0 : index
    %0 = vector.load %arg1[%c0, %c0_0] : memref<16x66xf32, #tpu.memory_space<vmem>>, vector<16x66xf32>
    %c0_1 = arith.constant 0 : index
    %c0_2 = arith.constant 0 : index
    %1 = vector.load %arg5[%c0_1, %c0_2] : memref<66x64xbf16, #tpu.memory_space<vmem>>, vector<66x64xbf16>
    %2 = arith.extf %1 : vector<66x64xbf16> to vector<66x64xf32>
    %cst = arith.constant dense<0.000000e+00> : vector<16x64xf32>
    %3 = tpu.matmul %0, %2, %cst {dimension_numbers = #tpu.dot_dimension_numbers<[1], [0], [0], [1], [0, 0, 1, 1], [], []>} : vector<16x66xf32>, vector<66x64xf32>, vector<16x64xf32> -> vector<16x64xf32>
    %c0_3 = arith.constant 0 : index
    %c0_4 = arith.constant 0 : index
    %4 = vector.load %arg4[%c0_3, %c0_4] : memref<1x640xf32, #tpu.memory_space<vmem>>, vector<1x64xf32>
    %5 = vector.broadcast %4 : vector<1x64xf32> to vector<16x64xf32>
    %6 = arith.addf %3, %5 : vector<16x64xf32>
    %cst_5 = arith.constant 0.000000e+00 : f32
    %7 = vector.broadcast %cst_5 : f32 to vector<16x64xf32>
    %8 = arith.maximumf %6, %7 : vector<16x64xf32>
    %c0_6 = arith.constant 0 : index
    %c0_7 = arith.constant 0 : index
    %9 = vector.load %arg6[%c0_6, %c0_7] : memref<64x22xbf16, #tpu.memory_space<vmem>>, vector<64x22xbf16>
    %10 = arith.extf %9 : vector<64x22xbf16> to vector<64x22xf32>
    %cst_8 = arith.constant dense<0.000000e+00> : vector<16x22xf32>
    %11 = tpu.matmul %8, %10, %cst_8 {dimension_numbers = #tpu.dot_dimension_numbers<[1], [0], [0], [1], [0, 0, 1, 1], [], []>} : vector<16x64xf32>, vector<64x22xf32>, vector<16x22xf32> -> vector<16x22xf32>
    %c0_9 = arith.constant 0 : index
    %c128 = arith.constant 128 : index
    %12 = vector.load %arg4[%c0_9, %c128] : memref<1x640xf32, #tpu.memory_space<vmem>>, vector<1x22xf32>
    %13 = vector.broadcast %12 : vector<1x22xf32> to vector<16x22xf32>
    %14 = arith.addf %11, %13 : vector<16x22xf32>
    %cst_10 = arith.constant dense<0xFF800000> : vector<16xf32>
    %15 = vector.multi_reduction <maximumf>, %14, %cst_10 [1] : vector<16x22xf32> to vector<16xf32>
    %16 = vector.shape_cast %15 : vector<16xf32> to vector<16x1xf32>
    %17 = vector.broadcast %16 : vector<16x1xf32> to vector<16x22xf32>
    %18 = arith.subf %14, %17 : vector<16x22xf32>
    %19 = math.exp %18 : vector<16x22xf32>
    %cst_11 = arith.constant dense<0.000000e+00> : vector<16xf32>
    %20 = vector.multi_reduction <add>, %19, %cst_11 [1] : vector<16x22xf32> to vector<16xf32>
    %21 = vector.shape_cast %20 : vector<16xf32> to vector<16x1xf32>
    %22 = tpu.reciprocal %21 {approx = true} : vector<16x1xf32> -> vector<16x1xf32>
    %23 = vector.broadcast %22 : vector<16x1xf32> to vector<16x22xf32>
    %24 = arith.mulf %19, %23 : vector<16x22xf32>
    %c0_12 = arith.constant 0 : index
    %c0_13 = arith.constant 0 : index
    %25 = vector.load %arg2[%c0_12, %c0_13] : memref<22x66xf32, #tpu.memory_space<vmem>>, vector<22x66xf32>
    %cst_14 = arith.constant dense<0.000000e+00> : vector<16x66xf32>
    %26 = tpu.matmul %24, %25, %cst_14 {dimension_numbers = #tpu.dot_dimension_numbers<[1], [0], [0], [1], [0, 0, 1, 1], [], []>} : vector<16x22xf32>, vector<22x66xf32>, vector<16x66xf32> -> vector<16x66xf32>
    %27 = arith.mulf %0, %26 : vector<16x66xf32>
    %c0_15 = arith.constant 0 : index
    %c0_16 = arith.constant 0 : index
    %28 = vector.load %arg7[%c0_15, %c0_16] : memref<66x128xbf16, #tpu.memory_space<vmem>>, vector<66x128xbf16>
    %29 = arith.extf %28 : vector<66x128xbf16> to vector<66x128xf32>
    %cst_17 = arith.constant dense<0.000000e+00> : vector<16x128xf32>
    %30 = tpu.matmul %27, %29, %cst_17 {dimension_numbers = #tpu.dot_dimension_numbers<[1], [0], [0], [1], [0, 0, 1, 1], [], []>} : vector<16x66xf32>, vector<66x128xf32>, vector<16x128xf32> -> vector<16x128xf32>
    %c0_18 = arith.constant 0 : index
    %c256 = arith.constant 256 : index
    %31 = vector.load %arg4[%c0_18, %c256] : memref<1x640xf32, #tpu.memory_space<vmem>>, vector<1x128xf32>
    %32 = vector.broadcast %31 : vector<1x128xf32> to vector<16x128xf32>
    %33 = arith.addf %30, %32 : vector<16x128xf32>
    %c0_i32 = arith.constant 0 : i32
    %34 = arith.index_cast %c0_i32 : i32 to index
    %c0_19 = arith.constant 0 : index
    %c0_20 = arith.constant 0 : index
    %35 = vector.load %arg3[%34, %c0_19, %c0_20] : memref<3x16x128xf32, #tpu.memory_space<vmem>>, vector<1x16x128xf32>
    %36 = vector.shape_cast %35 : vector<1x16x128xf32> to vector<16x128xf32>
    %37 = arith.index_cast %c0_i32 : i32 to index
    %c0_21 = arith.constant 0 : index
    %c0_22 = arith.constant 0 : index
    %38 = vector.load %arg8[%37, %c0_21, %c0_22] : memref<3x128x384xbf16, #tpu.memory_space<vmem>>, vector<1x128x384xbf16>
    %39 = vector.shape_cast %38 : vector<1x128x384xbf16> to vector<128x384xbf16>
    %40 = arith.extf %39 : vector<128x384xbf16> to vector<128x384xf32>
    %cst_23 = arith.constant dense<0.000000e+00> : vector<16x384xf32>
    %41 = tpu.matmul %33, %40, %cst_23 {dimension_numbers = #tpu.dot_dimension_numbers<[1], [0], [0], [1], [0, 0, 1, 1], [], []>} : vector<16x128xf32>, vector<128x384xf32>, vector<16x384xf32> -> vector<16x384xf32>
    %42 = arith.index_cast %c0_i32 : i32 to index
    %c0_24 = arith.constant 0 : index
    %c0_25 = arith.constant 0 : index
    %43 = vector.load %arg9[%42, %c0_24, %c0_25] : memref<3x1x384xf32, #tpu.memory_space<vmem>>, vector<1x1x384xf32>
    %44 = vector.shape_cast %43 : vector<1x1x384xf32> to vector<1x384xf32>
    %45 = vector.broadcast %44 : vector<1x384xf32> to vector<16x384xf32>
    %46 = arith.addf %41, %45 : vector<16x384xf32>
    %47 = arith.index_cast %c0_i32 : i32 to index
    %c0_26 = arith.constant 0 : index
    %c0_27 = arith.constant 0 : index
    %48 = vector.load %arg10[%47, %c0_26, %c0_27] : memref<3x128x256xbf16, #tpu.memory_space<vmem>>, vector<1x128x256xbf16>
    %49 = vector.shape_cast %48 : vector<1x128x256xbf16> to vector<128x256xbf16>
    %50 = arith.extf %49 : vector<128x256xbf16> to vector<128x256xf32>
    %cst_28 = arith.constant dense<0.000000e+00> : vector<16x256xf32>
    %51 = tpu.matmul %36, %50, %cst_28 {dimension_numbers = #tpu.dot_dimension_numbers<[1], [0], [0], [1], [0, 0, 1, 1], [], []>} : vector<16x128xf32>, vector<128x256xf32>, vector<16x256xf32> -> vector<16x256xf32>
    %52 = vector.extract_strided_slice %46 {offsets = [0, 0], sizes = [16, 128], strides = [1, 1]} : vector<16x384xf32> to vector<16x128xf32>
    %53 = vector.extract_strided_slice %51 {offsets = [0, 0], sizes = [16, 128], strides = [1, 1]} : vector<16x256xf32> to vector<16x128xf32>
    %54 = arith.addf %52, %53 : vector<16x128xf32>
    %cst_29 = arith.constant 5.000000e-01 : f32
    %55 = vector.broadcast %cst_29 : f32 to vector<16x128xf32>
    %56 = arith.mulf %55, %54 : vector<16x128xf32>
    %57 = math.tanh %56 : vector<16x128xf32>
    %cst_30 = arith.constant 5.000000e-01 : f32
    %58 = vector.broadcast %cst_30 : f32 to vector<16x128xf32>
    %59 = arith.mulf %58, %57 : vector<16x128xf32>
    %cst_31 = arith.constant 5.000000e-01 : f32
    %60 = vector.broadcast %cst_31 : f32 to vector<16x128xf32>
    %61 = arith.addf %59, %60 : vector<16x128xf32>
    %62 = vector.extract_strided_slice %46 {offsets = [0, 128], sizes = [16, 128], strides = [1, 1]} : vector<16x384xf32> to vector<16x128xf32>
    %63 = vector.extract_strided_slice %51 {offsets = [0, 128], sizes = [16, 128], strides = [1, 1]} : vector<16x256xf32> to vector<16x128xf32>
    %64 = arith.addf %62, %63 : vector<16x128xf32>
    %cst_32 = arith.constant 5.000000e-01 : f32
    %65 = vector.broadcast %cst_32 : f32 to vector<16x128xf32>
    %66 = arith.mulf %65, %64 : vector<16x128xf32>
    %67 = math.tanh %66 : vector<16x128xf32>
    %cst_33 = arith.constant 5.000000e-01 : f32
    %68 = vector.broadcast %cst_33 : f32 to vector<16x128xf32>
    %69 = arith.mulf %68, %67 : vector<16x128xf32>
    %cst_34 = arith.constant 5.000000e-01 : f32
    %70 = vector.broadcast %cst_34 : f32 to vector<16x128xf32>
    %71 = arith.addf %69, %70 : vector<16x128xf32>
    %72 = vector.extract_strided_slice %46 {offsets = [0, 256], sizes = [16, 128], strides = [1, 1]} : vector<16x384xf32> to vector<16x128xf32>
    %73 = arith.mulf %71, %36 : vector<16x128xf32>
    %74 = arith.index_cast %c0_i32 : i32 to index
    %c0_35 = arith.constant 0 : index
    %c0_36 = arith.constant 0 : index
    %75 = vector.load %arg11[%74, %c0_35, %c0_36] : memref<3x128x128xbf16, #tpu.memory_space<vmem>>, vector<1x128x128xbf16>
    %76 = vector.shape_cast %75 : vector<1x128x128xbf16> to vector<128x128xbf16>
    %77 = arith.extf %76 : vector<128x128xbf16> to vector<128x128xf32>
    %cst_37 = arith.constant dense<0.000000e+00> : vector<16x128xf32>
    %78 = tpu.matmul %73, %77, %cst_37 {dimension_numbers = #tpu.dot_dimension_numbers<[1], [0], [0], [1], [0, 0, 1, 1], [], []>} : vector<16x128xf32>, vector<128x128xf32>, vector<16x128xf32> -> vector<16x128xf32>
    %79 = arith.addf %72, %78 : vector<16x128xf32>
    %80 = math.tanh %79 : vector<16x128xf32>
    %cst_38 = arith.constant 1.000000e+00 : f32
    %81 = vector.broadcast %cst_38 : f32 to vector<16x128xf32>
    %82 = arith.subf %81, %61 : vector<16x128xf32>
    %83 = arith.mulf %82, %36 : vector<16x128xf32>
    %84 = arith.mulf %61, %80 : vector<16x128xf32>
    %85 = arith.addf %83, %84 : vector<16x128xf32>
    %86 = arith.index_cast %c0_i32 : i32 to index
    %c0_39 = arith.constant 0 : index
    %c0_40 = arith.constant 0 : index
    %87 = vector.load %arg17[%86, %c0_39, %c0_40] : memref<3x16x128xf32, #tpu.memory_space<vmem>>, vector<1x16x128xf32>
    %88 = vector.shape_cast %87 : vector<1x16x128xf32> to vector<16x128xf32>
    %89 = vector.shape_cast %85 : vector<16x128xf32> to vector<1x16x128xf32>
    tpu.vector_store %arg17[%86, %c0_39, %c0_40], %89 {strides = array<i32>} : memref<3x16x128xf32, #tpu.memory_space<vmem>>, vector<1x16x128xf32>,
    %90 = arith.index_cast %c0_i32 : i32 to index
    %c0_41 = arith.constant 0 : index
    %c0_42 = arith.constant 0 : index
    %91 = vector.load %arg12[%90, %c0_41, %c0_42] : memref<2x128x128xbf16, #tpu.memory_space<vmem>>, vector<1x128x128xbf16>
    %92 = vector.shape_cast %91 : vector<1x128x128xbf16> to vector<128x128xbf16>
    %93 = arith.extf %92 : vector<128x128xbf16> to vector<128x128xf32>
    %cst_43 = arith.constant dense<0.000000e+00> : vector<16x128xf32>
    %94 = tpu.matmul %85, %93, %cst_43 {dimension_numbers = #tpu.dot_dimension_numbers<[1], [0], [0], [1], [0, 0, 1, 1], [], []>} : vector<16x128xf32>, vector<128x128xf32>, vector<16x128xf32> -> vector<16x128xf32>
    %95 = arith.addf %33, %94 : vector<16x128xf32>
    %96 = arith.index_cast %c0_i32 : i32 to index
    %c0_44 = arith.constant 0 : index
    %c0_45 = arith.constant 0 : index
    %97 = vector.load %arg13[%96, %c0_44, %c0_45] : memref<2x1x128xf32, #tpu.memory_space<vmem>>, vector<1x1x128xf32>
    %98 = vector.shape_cast %97 : vector<1x1x128xf32> to vector<1x128xf32>
    %99 = vector.broadcast %98 : vector<1x128xf32> to vector<16x128xf32>
    %100 = arith.addf %95, %99 : vector<16x128xf32>
    %c1_i32 = arith.constant 1 : i32
    %101 = arith.index_cast %c1_i32 : i32 to index
    %c0_46 = arith.constant 0 : index
    %c0_47 = arith.constant 0 : index
    %102 = vector.load %arg3[%101, %c0_46, %c0_47] : memref<3x16x128xf32, #tpu.memory_space<vmem>>, vector<1x16x128xf32>
    %103 = vector.shape_cast %102 : vector<1x16x128xf32> to vector<16x128xf32>
    %104 = arith.index_cast %c1_i32 : i32 to index
    %c0_48 = arith.constant 0 : index
    %c0_49 = arith.constant 0 : index
    %105 = vector.load %arg8[%104, %c0_48, %c0_49] : memref<3x128x384xbf16, #tpu.memory_space<vmem>>, vector<1x128x384xbf16>
    %106 = vector.shape_cast %105 : vector<1x128x384xbf16> to vector<128x384xbf16>
    %107 = arith.extf %106 : vector<128x384xbf16> to vector<128x384xf32>
    %cst_50 = arith.constant dense<0.000000e+00> : vector<16x384xf32>
    %108 = tpu.matmul %100, %107, %cst_50 {dimension_numbers = #tpu.dot_dimension_numbers<[1], [0], [0], [1], [0, 0, 1, 1], [], []>} : vector<16x128xf32>, vector<128x384xf32>, vector<16x384xf32> -> vector<16x384xf32>
    %109 = arith.index_cast %c1_i32 : i32 to index
    %c0_51 = arith.constant 0 : index
    %c0_52 = arith.constant 0 : index
    %110 = vector.load %arg9[%109, %c0_51, %c0_52] : memref<3x1x384xf32, #tpu.memory_space<vmem>>, vector<1x1x384xf32>
    %111 = vector.shape_cast %110 : vector<1x1x384xf32> to vector<1x384xf32>
    %112 = vector.broadcast %111 : vector<1x384xf32> to vector<16x384xf32>
    %113 = arith.addf %108, %112 : vector<16x384xf32>
    %114 = arith.index_cast %c1_i32 : i32 to index
    %c0_53 = arith.constant 0 : index
    %c0_54 = arith.constant 0 : index
    %115 = vector.load %arg10[%114, %c0_53, %c0_54] : memref<3x128x256xbf16, #tpu.memory_space<vmem>>, vector<1x128x256xbf16>
    %116 = vector.shape_cast %115 : vector<1x128x256xbf16> to vector<128x256xbf16>
    %117 = arith.extf %116 : vector<128x256xbf16> to vector<128x256xf32>
    %cst_55 = arith.constant dense<0.000000e+00> : vector<16x256xf32>
    %118 = tpu.matmul %103, %117, %cst_55 {dimension_numbers = #tpu.dot_dimension_numbers<[1], [0], [0], [1], [0, 0, 1, 1], [], []>} : vector<16x128xf32>, vector<128x256xf32>, vector<16x256xf32> -> vector<16x256xf32>
    %119 = vector.extract_strided_slice %113 {offsets = [0, 0], sizes = [16, 128], strides = [1, 1]} : vector<16x384xf32> to vector<16x128xf32>
    %120 = vector.extract_strided_slice %118 {offsets = [0, 0], sizes = [16, 128], strides = [1, 1]} : vector<16x256xf32> to vector<16x128xf32>
    %121 = arith.addf %119, %120 : vector<16x128xf32>
    %cst_56 = arith.constant 5.000000e-01 : f32
    %122 = vector.broadcast %cst_56 : f32 to vector<16x128xf32>
    %123 = arith.mulf %122, %121 : vector<16x128xf32>
    %124 = math.tanh %123 : vector<16x128xf32>
    %cst_57 = arith.constant 5.000000e-01 : f32
    %125 = vector.broadcast %cst_57 : f32 to vector<16x128xf32>
    %126 = arith.mulf %125, %124 : vector<16x128xf32>
    %cst_58 = arith.constant 5.000000e-01 : f32
    %127 = vector.broadcast %cst_58 : f32 to vector<16x128xf32>
    %128 = arith.addf %126, %127 : vector<16x128xf32>
    %129 = vector.extract_strided_slice %113 {offsets = [0, 128], sizes = [16, 128], strides = [1, 1]} : vector<16x384xf32> to vector<16x128xf32>
    %130 = vector.extract_strided_slice %118 {offsets = [0, 128], sizes = [16, 128], strides = [1, 1]} : vector<16x256xf32> to vector<16x128xf32>
    %131 = arith.addf %129, %130 : vector<16x128xf32>
    %cst_59 = arith.constant 5.000000e-01 : f32
    %132 = vector.broadcast %cst_59 : f32 to vector<16x128xf32>
    %133 = arith.mulf %132, %131 : vector<16x128xf32>
    %134 = math.tanh %133 : vector<16x128xf32>
    %cst_60 = arith.constant 5.000000e-01 : f32
    %135 = vector.broadcast %cst_60 : f32 to vector<16x128xf32>
    %136 = arith.mulf %135, %134 : vector<16x128xf32>
    %cst_61 = arith.constant 5.000000e-01 : f32
    %137 = vector.broadcast %cst_61 : f32 to vector<16x128xf32>
    %138 = arith.addf %136, %137 : vector<16x128xf32>
    %139 = vector.extract_strided_slice %113 {offsets = [0, 256], sizes = [16, 128], strides = [1, 1]} : vector<16x384xf32> to vector<16x128xf32>
    %140 = arith.mulf %138, %103 : vector<16x128xf32>
    %141 = arith.index_cast %c1_i32 : i32 to index
    %c0_62 = arith.constant 0 : index
    %c0_63 = arith.constant 0 : index
    %142 = vector.load %arg11[%141, %c0_62, %c0_63] : memref<3x128x128xbf16, #tpu.memory_space<vmem>>, vector<1x128x128xbf16>
    %143 = vector.shape_cast %142 : vector<1x128x128xbf16> to vector<128x128xbf16>
    %144 = arith.extf %143 : vector<128x128xbf16> to vector<128x128xf32>
    %cst_64 = arith.constant dense<0.000000e+00> : vector<16x128xf32>
    %145 = tpu.matmul %140, %144, %cst_64 {dimension_numbers = #tpu.dot_dimension_numbers<[1], [0], [0], [1], [0, 0, 1, 1], [], []>} : vector<16x128xf32>, vector<128x128xf32>, vector<16x128xf32> -> vector<16x128xf32>
    %146 = arith.addf %139, %145 : vector<16x128xf32>
    %147 = math.tanh %146 : vector<16x128xf32>
    %cst_65 = arith.constant 1.000000e+00 : f32
    %148 = vector.broadcast %cst_65 : f32 to vector<16x128xf32>
    %149 = arith.subf %148, %128 : vector<16x128xf32>
    %150 = arith.mulf %149, %103 : vector<16x128xf32>
    %151 = arith.mulf %128, %147 : vector<16x128xf32>
    %152 = arith.addf %150, %151 : vector<16x128xf32>
    %153 = arith.index_cast %c1_i32 : i32 to index
    %c0_66 = arith.constant 0 : index
    %c0_67 = arith.constant 0 : index
    %154 = vector.load %arg17[%153, %c0_66, %c0_67] : memref<3x16x128xf32, #tpu.memory_space<vmem>>, vector<1x16x128xf32>
    %155 = vector.shape_cast %154 : vector<1x16x128xf32> to vector<16x128xf32>
    %156 = vector.shape_cast %152 : vector<16x128xf32> to vector<1x16x128xf32>
    tpu.vector_store %arg17[%153, %c0_66, %c0_67], %156 {strides = array<i32>} : memref<3x16x128xf32, #tpu.memory_space<vmem>>, vector<1x16x128xf32>,
    %157 = arith.index_cast %c1_i32 : i32 to index
    %c0_68 = arith.constant 0 : index
    %c0_69 = arith.constant 0 : index
    %158 = vector.load %arg12[%157, %c0_68, %c0_69] : memref<2x128x128xbf16, #tpu.memory_space<vmem>>, vector<1x128x128xbf16>
    %159 = vector.shape_cast %158 : vector<1x128x128xbf16> to vector<128x128xbf16>
    %160 = arith.extf %159 : vector<128x128xbf16> to vector<128x128xf32>
    %cst_70 = arith.constant dense<0.000000e+00> : vector<16x128xf32>
    %161 = tpu.matmul %152, %160, %cst_70 {dimension_numbers = #tpu.dot_dimension_numbers<[1], [0], [0], [1], [0, 0, 1, 1], [], []>} : vector<16x128xf32>, vector<128x128xf32>, vector<16x128xf32> -> vector<16x128xf32>
    %162 = arith.addf %100, %161 : vector<16x128xf32>
    %163 = arith.index_cast %c1_i32 : i32 to index
    %c0_71 = arith.constant 0 : index
    %c0_72 = arith.constant 0 : index
    %164 = vector.load %arg13[%163, %c0_71, %c0_72] : memref<2x1x128xf32, #tpu.memory_space<vmem>>, vector<1x1x128xf32>
    %165 = vector.shape_cast %164 : vector<1x1x128xf32> to vector<1x128xf32>
    %166 = vector.broadcast %165 : vector<1x128xf32> to vector<16x128xf32>
    %167 = arith.addf %162, %166 : vector<16x128xf32>
    %c2_i32 = arith.constant 2 : i32
    %c2 = arith.constant 2 : index
    %c0_73 = arith.constant 0 : index
    %c0_74 = arith.constant 0 : index
    %168 = vector.load %arg3[%c2, %c0_73, %c0_74] : memref<3x16x128xf32, #tpu.memory_space<vmem>>, vector<1x16x128xf32>
    %169 = vector.shape_cast %168 : vector<1x16x128xf32> to vector<16x128xf32>
    %c2_75 = arith.constant 2 : index
    %c0_76 = arith.constant 0 : index
    %c0_77 = arith.constant 0 : index
    %170 = vector.load %arg8[%c2_75, %c0_76, %c0_77] : memref<3x128x384xbf16, #tpu.memory_space<vmem>>, vector<1x128x384xbf16>
    %171 = vector.shape_cast %170 : vector<1x128x384xbf16> to vector<128x384xbf16>
    %172 = arith.extf %171 : vector<128x384xbf16> to vector<128x384xf32>
    %cst_78 = arith.constant dense<0.000000e+00> : vector<16x384xf32>
    %173 = tpu.matmul %167, %172, %cst_78 {dimension_numbers = #tpu.dot_dimension_numbers<[1], [0], [0], [1], [0, 0, 1, 1], [], []>} : vector<16x128xf32>, vector<128x384xf32>, vector<16x384xf32> -> vector<16x384xf32>
    %c2_79 = arith.constant 2 : index
    %c0_80 = arith.constant 0 : index
    %c0_81 = arith.constant 0 : index
    %174 = vector.load %arg9[%c2_79, %c0_80, %c0_81] : memref<3x1x384xf32, #tpu.memory_space<vmem>>, vector<1x1x384xf32>
    %175 = vector.shape_cast %174 : vector<1x1x384xf32> to vector<1x384xf32>
    %176 = vector.broadcast %175 : vector<1x384xf32> to vector<16x384xf32>
    %177 = arith.addf %173, %176 : vector<16x384xf32>
    %c2_82 = arith.constant 2 : index
    %c0_83 = arith.constant 0 : index
    %c0_84 = arith.constant 0 : index
    %178 = vector.load %arg10[%c2_82, %c0_83, %c0_84] : memref<3x128x256xbf16, #tpu.memory_space<vmem>>, vector<1x128x256xbf16>
    %179 = vector.shape_cast %178 : vector<1x128x256xbf16> to vector<128x256xbf16>
    %180 = arith.extf %179 : vector<128x256xbf16> to vector<128x256xf32>
    %cst_85 = arith.constant dense<0.000000e+00> : vector<16x256xf32>
    %181 = tpu.matmul %169, %180, %cst_85 {dimension_numbers = #tpu.dot_dimension_numbers<[1], [0], [0], [1], [0, 0, 1, 1], [], []>} : vector<16x128xf32>, vector<128x256xf32>, vector<16x256xf32> -> vector<16x256xf32>
    %182 = vector.extract_strided_slice %177 {offsets = [0, 0], sizes = [16, 128], strides = [1, 1]} : vector<16x384xf32> to vector<16x128xf32>
    %183 = vector.extract_strided_slice %181 {offsets = [0, 0], sizes = [16, 128], strides = [1, 1]} : vector<16x256xf32> to vector<16x128xf32>
    %184 = arith.addf %182, %183 : vector<16x128xf32>
    %cst_86 = arith.constant 5.000000e-01 : f32
    %185 = vector.broadcast %cst_86 : f32 to vector<16x128xf32>
    %186 = arith.mulf %185, %184 : vector<16x128xf32>
    %187 = math.tanh %186 : vector<16x128xf32>
    %cst_87 = arith.constant 5.000000e-01 : f32
    %188 = vector.broadcast %cst_87 : f32 to vector<16x128xf32>
    %189 = arith.mulf %188, %187 : vector<16x128xf32>
    %cst_88 = arith.constant 5.000000e-01 : f32
    %190 = vector.broadcast %cst_88 : f32 to vector<16x128xf32>
    %191 = arith.addf %189, %190 : vector<16x128xf32>
    %192 = vector.extract_strided_slice %177 {offsets = [0, 128], sizes = [16, 128], strides = [1, 1]} : vector<16x384xf32> to vector<16x128xf32>
    %193 = vector.extract_strided_slice %181 {offsets = [0, 128], sizes = [16, 128], strides = [1, 1]} : vector<16x256xf32> to vector<16x128xf32>
    %194 = arith.addf %192, %193 : vector<16x128xf32>
    %cst_89 = arith.constant 5.000000e-01 : f32
    %195 = vector.broadcast %cst_89 : f32 to vector<16x128xf32>
    %196 = arith.mulf %195, %194 : vector<16x128xf32>
    %197 = math.tanh %196 : vector<16x128xf32>
    %cst_90 = arith.constant 5.000000e-01 : f32
    %198 = vector.broadcast %cst_90 : f32 to vector<16x128xf32>
    %199 = arith.mulf %198, %197 : vector<16x128xf32>
    %cst_91 = arith.constant 5.000000e-01 : f32
    %200 = vector.broadcast %cst_91 : f32 to vector<16x128xf32>
    %201 = arith.addf %199, %200 : vector<16x128xf32>
    %202 = vector.extract_strided_slice %177 {offsets = [0, 256], sizes = [16, 128], strides = [1, 1]} : vector<16x384xf32> to vector<16x128xf32>
    %203 = arith.mulf %201, %169 : vector<16x128xf32>
    %c2_92 = arith.constant 2 : index
    %c0_93 = arith.constant 0 : index
    %c0_94 = arith.constant 0 : index
    %204 = vector.load %arg11[%c2_92, %c0_93, %c0_94] : memref<3x128x128xbf16, #tpu.memory_space<vmem>>, vector<1x128x128xbf16>
    %205 = vector.shape_cast %204 : vector<1x128x128xbf16> to vector<128x128xbf16>
    %206 = arith.extf %205 : vector<128x128xbf16> to vector<128x128xf32>
    %cst_95 = arith.constant dense<0.000000e+00> : vector<16x128xf32>
    %207 = tpu.matmul %203, %206, %cst_95 {dimension_numbers = #tpu.dot_dimension_numbers<[1], [0], [0], [1], [0, 0, 1, 1], [], []>} : vector<16x128xf32>, vector<128x128xf32>, vector<16x128xf32> -> vector<16x128xf32>
    %208 = arith.addf %202, %207 : vector<16x128xf32>
    %209 = math.tanh %208 : vector<16x128xf32>
    %cst_96 = arith.constant 1.000000e+00 : f32
    %210 = vector.broadcast %cst_96 : f32 to vector<16x128xf32>
    %211 = arith.subf %210, %191 : vector<16x128xf32>
    %212 = arith.mulf %211, %169 : vector<16x128xf32>
    %213 = arith.mulf %191, %209 : vector<16x128xf32>
    %214 = arith.addf %212, %213 : vector<16x128xf32>
    %c2_97 = arith.constant 2 : index
    %c0_98 = arith.constant 0 : index
    %c0_99 = arith.constant 0 : index
    %215 = vector.load %arg17[%c2_97, %c0_98, %c0_99] : memref<3x16x128xf32, #tpu.memory_space<vmem>>, vector<1x16x128xf32>
    %216 = vector.shape_cast %215 : vector<1x16x128xf32> to vector<16x128xf32>
    %217 = vector.shape_cast %214 : vector<16x128xf32> to vector<1x16x128xf32>
    tpu.vector_store %arg17[%c2_97, %c0_98, %c0_99], %217 {strides = array<i32>} : memref<3x16x128xf32, #tpu.memory_space<vmem>>, vector<1x16x128xf32>,
    %c0_100 = arith.constant 0 : index
    %c0_101 = arith.constant 0 : index
    %218 = vector.load %arg14[%c0_100, %c0_101] : memref<128x128xbf16, #tpu.memory_space<vmem>>, vector<128x128xbf16>
    %219 = arith.extf %218 : vector<128x128xbf16> to vector<128x128xf32>
    %cst_102 = arith.constant dense<0.000000e+00> : vector<16x128xf32>
    %220 = tpu.matmul %214, %219, %cst_102 {dimension_numbers = #tpu.dot_dimension_numbers<[1], [0], [0], [1], [0, 0, 1, 1], [], []>} : vector<16x128xf32>, vector<128x128xf32>, vector<16x128xf32> -> vector<16x128xf32>
    %c0_103 = arith.constant 0 : index
    %c384 = arith.constant 384 : index
    %221 = vector.load %arg4[%c0_103, %c384] : memref<1x640xf32, #tpu.memory_space<vmem>>, vector<1x128xf32>
    %222 = vector.broadcast %221 : vector<1x128xf32> to vector<16x128xf32>
    %223 = arith.addf %220, %222 : vector<16x128xf32>
    %cst_104 = arith.constant 0.000000e+00 : f32
    %224 = vector.broadcast %cst_104 : f32 to vector<16x128xf32>
    %225 = arith.maximumf %223, %224 : vector<16x128xf32>
    %c0_105 = arith.constant 0 : index
    %c0_106 = arith.constant 0 : index
    %226 = vector.load %arg15[%c0_105, %c0_106] : memref<128x128xbf16, #tpu.memory_space<vmem>>, vector<128x128xbf16>
    %227 = arith.extf %226 : vector<128x128xbf16> to vector<128x128xf32>
    %cst_107 = arith.constant dense<0.000000e+00> : vector<16x128xf32>
    %228 = tpu.matmul %225, %227, %cst_107 {dimension_numbers = #tpu.dot_dimension_numbers<[1], [0], [0], [1], [0, 0, 1, 1], [], []>} : vector<16x128xf32>, vector<128x128xf32>, vector<16x128xf32> -> vector<16x128xf32>
    %c0_108 = arith.constant 0 : index
    %c512 = arith.constant 512 : index
    %229 = vector.load %arg4[%c0_108, %c512] : memref<1x640xf32, #tpu.memory_space<vmem>>, vector<1x128xf32>
    %230 = vector.broadcast %229 : vector<1x128xf32> to vector<16x128xf32>
    %231 = arith.addf %228, %230 : vector<16x128xf32>
    %cst_109 = arith.constant dense<0xFF800000> : vector<16xf32>
    %232 = vector.multi_reduction <maximumf>, %231, %cst_109 [1] : vector<16x128xf32> to vector<16xf32>
    %233 = vector.shape_cast %232 : vector<16xf32> to vector<16x1xf32>
    %234 = vector.broadcast %233 : vector<16x1xf32> to vector<16x128xf32>
    %235 = arith.subf %231, %234 : vector<16x128xf32>
    %236 = math.exp %235 : vector<16x128xf32>
    %cst_110 = arith.constant dense<0.000000e+00> : vector<16xf32>
    %237 = vector.multi_reduction <add>, %236, %cst_110 [1] : vector<16x128xf32> to vector<16xf32>
    %238 = vector.shape_cast %237 : vector<16xf32> to vector<16x1xf32>
    %239 = math.log %238 : vector<16x1xf32>
    %240 = arith.addf %233, %239 : vector<16x1xf32>
    %241 = vector.broadcast %240 : vector<16x1xf32> to vector<16x128xf32>
    %242 = arith.subf %231, %241 : vector<16x128xf32>
    %c0_111 = arith.constant 0 : index
    %c0_112 = arith.constant 0 : index
    %243 = vector.load %arg16[%c0_111, %c0_112] : memref<16x128xf32, #tpu.memory_space<vmem>>, vector<16x128xf32>
    tpu.vector_store %arg16[%c0_111, %c0_112], %242 {strides = array<i32>} : memref<16x128xf32, #tpu.memory_space<vmem>>, vector<16x128xf32>,
    return
  }
  func.func @transform_0(%arg0: i32) -> (i32, i32) {
    %c0_i32 = arith.constant 0 : i32
    %c0_i32_0 = arith.constant 0 : i32
    return %arg0, %c0_i32 : i32, i32
  }
  func.func @transform_1(%arg0: i32) -> (i32, i32) {
    %c0_i32 = arith.constant 0 : i32
    %c0_i32_0 = arith.constant 0 : i32
    %c0_i32_1 = arith.constant 0 : i32
    return %c0_i32, %c0_i32_0 : i32, i32
  }
  func.func @transform_2(%arg0: i32) -> (i32, i32, i32) {
    %c0_i32 = arith.constant 0 : i32
    %c0_i32_0 = arith.constant 0 : i32
    %c0_i32_1 = arith.constant 0 : i32
    return %c0_i32, %arg0, %c0_i32_0 : i32, i32, i32
  }
  func.func @transform_3(%arg0: i32) -> (i32, i32) {
    %c0_i32 = arith.constant 0 : i32
    %c0_i32_0 = arith.constant 0 : i32
    %c0_i32_1 = arith.constant 0 : i32
    return %c0_i32, %c0_i32_0 : i32, i32
  }
  func.func @transform_4(%arg0: i32) -> (i32, i32) {
    %c0_i32 = arith.constant 0 : i32
    %c0_i32_0 = arith.constant 0 : i32
    %c0_i32_1 = arith.constant 0 : i32
    return %c0_i32, %c0_i32_0 : i32, i32
  }
  func.func @transform_5(%arg0: i32) -> (i32, i32) {
    %c0_i32 = arith.constant 0 : i32
    %c0_i32_0 = arith.constant 0 : i32
    %c0_i32_1 = arith.constant 0 : i32
    return %c0_i32, %c0_i32_0 : i32, i32
  }
  func.func @transform_6(%arg0: i32) -> (i32, i32) {
    %c0_i32 = arith.constant 0 : i32
    %c0_i32_0 = arith.constant 0 : i32
    %c0_i32_1 = arith.constant 0 : i32
    return %c0_i32, %c0_i32_0 : i32, i32
  }
  func.func @transform_7(%arg0: i32) -> (i32, i32, i32) {
    %c0_i32 = arith.constant 0 : i32
    %c0_i32_0 = arith.constant 0 : i32
    %c0_i32_1 = arith.constant 0 : i32
    %c0_i32_2 = arith.constant 0 : i32
    return %c0_i32, %c0_i32_0, %c0_i32_1 : i32, i32, i32
  }
  func.func @transform_8(%arg0: i32) -> (i32, i32, i32) {
    %c0_i32 = arith.constant 0 : i32
    %c0_i32_0 = arith.constant 0 : i32
    %c0_i32_1 = arith.constant 0 : i32
    %c0_i32_2 = arith.constant 0 : i32
    return %c0_i32, %c0_i32_0, %c0_i32_1 : i32, i32, i32
  }
  func.func @transform_9(%arg0: i32) -> (i32, i32, i32) {
    %c0_i32 = arith.constant 0 : i32
    %c0_i32_0 = arith.constant 0 : i32
    %c0_i32_1 = arith.constant 0 : i32
    %c0_i32_2 = arith.constant 0 : i32
    return %c0_i32, %c0_i32_0, %c0_i32_1 : i32, i32, i32
  }
  func.func @transform_10(%arg0: i32) -> (i32, i32, i32) {
    %c0_i32 = arith.constant 0 : i32
    %c0_i32_0 = arith.constant 0 : i32
    %c0_i32_1 = arith.constant 0 : i32
    %c0_i32_2 = arith.constant 0 : i32
    return %c0_i32, %c0_i32_0, %c0_i32_1 : i32, i32, i32
  }
  func.func @transform_11(%arg0: i32) -> (i32, i32, i32) {
    %c0_i32 = arith.constant 0 : i32
    %c0_i32_0 = arith.constant 0 : i32
    %c0_i32_1 = arith.constant 0 : i32
    %c0_i32_2 = arith.constant 0 : i32
    return %c0_i32, %c0_i32_0, %c0_i32_1 : i32, i32, i32
  }
  func.func @transform_12(%arg0: i32) -> (i32, i32, i32) {
    %c0_i32 = arith.constant 0 : i32
    %c0_i32_0 = arith.constant 0 : i32
    %c0_i32_1 = arith.constant 0 : i32
    %c0_i32_2 = arith.constant 0 : i32
    return %c0_i32, %c0_i32_0, %c0_i32_1 : i32, i32, i32
  }
  func.func @transform_13(%arg0: i32) -> (i32, i32) {
    %c0_i32 = arith.constant 0 : i32
    %c0_i32_0 = arith.constant 0 : i32
    %c0_i32_1 = arith.constant 0 : i32
    return %c0_i32, %c0_i32_0 : i32, i32
  }
  func.func @transform_14(%arg0: i32) -> (i32, i32) {
    %c0_i32 = arith.constant 0 : i32
    %c0_i32_0 = arith.constant 0 : i32
    %c0_i32_1 = arith.constant 0 : i32
    return %c0_i32, %c0_i32_0 : i32, i32
  }
  func.func @transform_15(%arg0: i32) -> (i32, i32) {
    %c0_i32 = arith.constant 0 : i32
    %c0_i32_0 = arith.constant 0 : i32
    return %arg0, %c0_i32 : i32, i32
  }
  func.func @transform_16(%arg0: i32) -> (i32, i32, i32) {
    %c0_i32 = arith.constant 0 : i32
    %c0_i32_0 = arith.constant 0 : i32
    %c0_i32_1 = arith.constant 0 : i32
    return %c0_i32, %arg0, %c0_i32_0 : i32, i32, i32
  }
}

</mosaic_0001>

<bundles_post_ra>
// kernel: streaming_sight_mu.1
= control target key start
LH: loop header
LB: loop body
LE: loop exit
PB: predicated region body
PF: predicated region fallthrough
CT: control target
= control target key end

     0   :  { %s5517_s0 = inlined_call_operand.hbm [shape: f32[16,66], index: 0, kind: input, shape index: {}]   ;;  %s5518_s1 = inlined_call_operand.vmem [shape: f32[22,66], index: 1, kind: input, shape index: {}]   ;;  %s5519_s2 = inlined_call_operand.hbm [shape: f32[3,16,128], index: 2, kind: input, shape index: {}, may-alias: {2,16}]   ;;  %s5520_s3 = inlined_call_operand.hbm [shape: f32[1,640], index: 3, kind: input, shape index: {}]   ;;  %s5521_s4 = inlined_call_operand.vmem [shape: bf16[66,64], index: 4, kind: input, shape index: {}]   ;;  %s5522_s5 = inlined_call_operand.vmem [shape: bf16[64,22], index: 5, kind: input, shape index: {}]   ;;  %s5523_s6 = inlined_call_operand.hbm [shape: bf16[66,128], index: 6, kind: input, shape index: {}]   ;;  %s5524_s7 = inlined_call_operand.hbm [shape: bf16[3,128,384], index: 7, kind: input, shape index: {}]   ;;  %s5525_s8 = inlined_call_operand.vmem [shape: f32[3,1,384], index: 8, kind: input, shape index: {}]   ;;  %s5526_s9 = inlined_call_operand.hbm [shape: bf16[3,128,256], index: 9, kind: input, shape index: {}]   ;;  %s5527_s10 = inlined_call_operand.hbm [shape: bf16[3,128,128], index: 10, kind: input, shape index: {}]   ;;  %s5528_s11 = inlined_call_operand.vmem [shape: bf16[2,128,128], index: 11, kind: input, shape index: {}]   ;;  %s5529_s12 = inlined_call_operand.hbm [shape: f32[2,1,128], index: 12, kind: input, shape index: {}]   ;;  %s5530_s13 = inlined_call_operand.hbm [shape: bf16[128,128], index: 13, kind: input, shape index: {}]   ;;  %s5531_s14 = inlined_call_operand.hbm [shape: bf16[128,128], index: 14, kind: input, shape index: {}]   ;;  %s5532_s15 = inlined_call_operand.hbm [shape: f32[16,128], index: 15, kind: output, shape index: {0}]   ;;  %s5533_s16 = inlined_call_operand.hbm [shape: f32[3,16,128], index: 16, kind: output, shape index: {1}, may-alias: {2,16}]  }
   0x1   :  { %5544 = sst [smem:[#allocation30_spill]] %s5517_s0 }
   0x2   :  { %5545 = sst [smem:[#allocation31_spill]] %s5532_s15 }
   0x3   :  { %22 = vsyncpa [#allocation3], 0 }
   0x4   :  { %23 = vsyncpa [#allocation6], 0 }
   0x5   :  { %24 = vsyncpa [#allocation9], 0 }
   0x6   :  { %25 = vsyncpa [#allocation12], 0 }
   0x7   :  { %26 = vsyncpa [#allocation15], 0 }
   0x8   :  { %27 = vsyncpa [#allocation18], 0 }
   0x9   :  { %28 = vsyncpa [#allocation4], 0 }
   0xa   :  { %29 = vsyncpa [#allocation21], 0  ;;  %s4998_s21 = smov [#allocation5]   ;;  %s4999_s23 = smov [#allocation8]  }
   0xb   :  { %s49_s22 = sshll.u32 %s4998_s21, 4  ;;  %s75_s24 = sshll.u32 %s4999_s23, 4  ;;  %s50_s22 = int_to_ptr.vmem [resolvable:$true] %s49_s22  ;;  %s5104_s24 = int_to_ptr.vmem [resolvable:$true] %s75_s24 }
   0xc   :  { %s4718_s27 = scalar_lea.hbm %s5519_s2, 768 }
   0xd   :  { %p4719_p0 = scmp.ne.s32.totalorder %s5519_s2, %s4718_s27  ;;  %p4722_p1 = scmp.lt.u32.totalorder %s4718_s27, %s5519_s2 }
   0xf   :  { %p4724_p2 = pnand %p4722_p1, %p4719_p0 }
  0x11   :  { %4727 = shalt.err (!%p4724_p2)
}
  0x12   :  { %s4728_s17 = scalar_lea.vmem %s50_s22, 768  ;;  %p4733_p4 = scmp.lt.s32.totalorder %s50_s22, %s50_s22 }
  0x13   :  { %p4729_p3 = scmp.ne.s32.totalorder %s50_s22, %s4728_s17  ;;  %p4734_p5 = scmp.lt.s32.totalorder %s4728_s17, %s4728_s17 }
  0x15   :  { %p4735_p6 = por %p4734_p5, %p4733_p4 }
  0x17   :  { %p4736_p7 = pnand %p4735_p6, %p4729_p3 }
  0x19   :  { %4739 = shalt.err (!%p4736_p7)
}
  0x1a   :  { %s5535_s18 = smov 128   ;;  %s5537_s19 = smov 8  }
  0x1b   :  { %55 = dma.hbm_to_vmem [thread:$0]  %s5519_s2, 768, %s50_s22, [#allocation6], %s5535_s18, %s5535_s18, %s5537_s19  }
  0x1c   :  { %s4740_s26 = scalar_lea.hbm %s5523_s6, 576 }
  0x1d   :  { %p4741_p8 = scmp.ne.s32.totalorder %s5523_s6, %s4740_s26  ;;  %p4744_p9 = scmp.lt.u32.totalorder %s4740_s26, %s5523_s6 }
  0x1f   :  { %p4746_p10 = pnand %p4744_p9, %p4741_p8 }
  0x21   :  { %4749 = shalt.err (!%p4746_p10)
}
  0x22   :  { %s4750_s0 = scalar_lea.vmem %s5104_s24, 576  ;;  %p4755_p12 = scmp.lt.s32.totalorder %s5104_s24, %s5104_s24 }
  0x23   :  { %p4751_p11 = scmp.ne.s32.totalorder %s5104_s24, %s4750_s0  ;;  %p4756_p13 = scmp.lt.s32.totalorder %s4750_s0, %s4750_s0 }
  0x25   :  { %p4757_p0 = por %p4756_p13, %p4755_p12 }
  0x27   :  { %p4758_p1 = pnand %p4757_p0, %p4751_p11 }
  0x29   :  { %4761 = shalt.err (!%p4758_p1)
}
  0x2a   :  { %s5539_s2 = smov 64   ;;  %s5541_s22 = smov 4  }
  0x2b   :  { %81 = dma.hbm_to_vmem [thread:$0]  %s5523_s6, 576, %s5104_s24, [#allocation9], %s5539_s2, %s5539_s2, %s5541_s22  }
  0x2c   :  { %s5004_s21 = smov [#allocation11]   ;;  %s5005_s25 = smov [#allocation14]  }
  0x2d   :  { %s101_s23 = sshll.u32 %s5004_s21, 4  ;;  %s127_s26 = sshll.u32 %s5005_s25, 4  ;;  %s102_s23 = int_to_ptr.vmem [resolvable:$true] %s101_s23  ;;  %s5141_s26 = int_to_ptr.vmem [resolvable:$true] %s127_s26 }
  0x2e   :  { %s4762_s29 = scalar_lea.hbm %s5526_s9, 6144 }
  0x2f   :  { %p4763_p2 = scmp.ne.s32.totalorder %s5526_s9, %s4762_s29  ;;  %p4766_p3 = scmp.lt.u32.totalorder %s4762_s29, %s5526_s9 }
  0x31   :  { %p4768_p4 = pnand %p4766_p3, %p4763_p2 }
  0x33   :  { %4771 = shalt.err (!%p4768_p4)
}
  0x34   :  { %s4772_s6 = scalar_lea.vmem %s102_s23, 6144  ;;  %p4777_p6 = scmp.lt.s32.totalorder %s102_s23, %s102_s23 }
  0x35   :  { %p4773_p5 = scmp.ne.s32.totalorder %s102_s23, %s4772_s6  ;;  %p4778_p7 = scmp.lt.s32.totalorder %s4772_s6, %s4772_s6 }
  0x37   :  { %p4779_p8 = por %p4778_p7, %p4777_p6 }
  0x39   :  { %p4780_p9 = pnand %p4779_p8, %p4773_p5 }
  0x3b   :  { %4783 = shalt.err (!%p4780_p9)
}
  0x3c   :  { %s5546_s24 = smov 8   ;;  %s5547_s17 = smov 128  }
  0x3d   :  { %107 = dma.hbm_to_vmem [thread:$0]  %s5526_s9, 6144, %s102_s23, [#allocation12], %s5547_s17, %s5547_s17, %s5546_s24  }
  0x3e   :  { %s4784_s18 = scalar_lea.hbm %s5529_s12, 32 }
  0x3f   :  { %p4785_p10 = scmp.ne.s32.totalorder %s5529_s12, %s4784_s18  ;;  %p4788_p11 = scmp.lt.u32.totalorder %s4784_s18, %s5529_s12 }
  0x41   :  { %p4790_p12 = pnand %p4788_p11, %p4785_p10 }
  0x43   :  { %4793 = shalt.err (!%p4790_p12)
}
  0x44   :  { %s4794_s0 = scalar_lea.vmem %s5141_s26, 32  ;;  %p4799_p0 = scmp.lt.s32.totalorder %s5141_s26, %s5141_s26 }
  0x45   :  { %p4795_p13 = scmp.ne.s32.totalorder %s5141_s26, %s4794_s0  ;;  %p4800_p1 = scmp.lt.s32.totalorder %s4794_s0, %s4794_s0 }
  0x47   :  { %p4801_p2 = por %p4800_p1, %p4799_p0 }
  0x49   :  { %p4802_p3 = pnand %p4801_p2, %p4795_p13 }
  0x4b   :  { %4805 = shalt.err (!%p4802_p3)
}
  0x4c   :  { %s5006_s9 = smov 16   ;;  %s5007_s23 = smov 1  }
  0x4d   :  { %133 = dma.hbm_to_vmem [thread:$0]  %s5529_s12, 32, %s5141_s26, [#allocation15], %s5006_s9, %s5006_s9, %s5007_s23  }
  0x4e   :  { %s5008_s21 = smov [#allocation2]   ;;  %s5009_s27 = smov [#allocation7]  }
  0x4f   :  { %s35_s25 = sshll.u32 %s5008_s21, 4  ;;  %s62_s18 = sshll.u32 %s5009_s27, 4  ;;  %s36_s25 = int_to_ptr.vmem [resolvable:$true] %s35_s25  ;;  %s63_s18 = int_to_ptr.vmem [resolvable:$true] %s62_s18 }
  0x50   :  { %s5548_s29 = sld [smem:[#allocation30_spill]] }
  0x56   :  { %s4806_s30 = scalar_lea.hbm %s5548_s29, 256 }
  0x57   :  { %p4807_p4 = scmp.ne.s32.totalorder %s5548_s29, %s4806_s30  ;;  %p4810_p5 = scmp.lt.u32.totalorder %s4806_s30, %s5548_s29 }
  0x59   :  { %p4812_p6 = pnand %p4810_p5, %p4807_p4 }
  0x5b   :  { %4815 = shalt.err (!%p4812_p6)
}
  0x5c   :  { %s4816_s12 = scalar_lea.vmem %s36_s25, 256  ;;  %p4821_p8 = scmp.lt.s32.totalorder %s36_s25, %s36_s25 }
  0x5d   :  { %p4817_p7 = scmp.ne.s32.totalorder %s36_s25, %s4816_s12  ;;  %p4822_p9 = scmp.lt.s32.totalorder %s4816_s12, %s4816_s12 }
  0x5f   :  { %p4823_p10 = por %p4822_p9, %p4821_p8 }
  0x61   :  { %p4824_p11 = pnand %p4823_p10, %p4817_p7 }
  0x63   :  { %4827 = shalt.err (!%p4824_p11)
}
  0x64   :  { %41 = dma.hbm_to_vmem [thread:$0]  %s5548_s29, 256, %s36_s25, [#allocation3], %s5547_s17, %s5547_s17, %s5546_s24  }
  0x65   :  { %s4828_s15 = scalar_lea.hbm %s5520_s3, 80 }
  0x66   :  { %p4829_p12 = scmp.ne.s32.totalorder %s5520_s3, %s4828_s15  ;;  %p4832_p13 = scmp.lt.u32.totalorder %s4828_s15, %s5520_s3 }
  0x68   :  { %p4834_p0 = pnand %p4832_p13, %p4829_p12 }
  0x6a   :  { %4837 = shalt.err (!%p4834_p0)
}
  0x6b   :  { %s4838_s27 = scalar_lea.vmem %s63_s18, 80  ;;  %s4842_s19 = scalar_lea.vmem %s63_s18, 96 }
  0x6c   :  { %p4839_p1 = scmp.ne.s32.totalorder %s63_s18, %s4838_s27  ;;  %p4843_p2 = scmp.lt.s32.totalorder %s63_s18, %s63_s18 }
  0x6d   :  { %p4844_p3 = scmp.lt.s32.totalorder %s4842_s19, %s4838_s27 }
  0x6f   :  { %p4845_p4 = por %p4844_p3, %p4843_p2 }
  0x71   :  { %p4846_p5 = pnand %p4845_p4, %p4839_p1 }
  0x73   :  { %4849 = shalt.err (!%p4846_p5)
}
  0x74   :  { %65 = dma.hbm_to_vmem [thread:$0]  %s5520_s3, 80, %s63_s18, [#allocation6]  }
  0x75   :  { %s5010_s29 = smov [#allocation10]   ;;  %s4850_s26 = scalar_lea.hbm %s5524_s7, 9216 }
  0x76   :  { %s87_s30 = sshll.u32 %s5010_s29, 4  ;;  %p4851_p6 = scmp.ne.s32.totalorder %s5524_s7, %s4850_s26  ;;  %s88_s30 = int_to_ptr.vmem [resolvable:$true] %s87_s30 }
  0x77   :  { %p4854_p7 = scmp.lt.u32.totalorder %s4850_s26, %s5524_s7 }
  0x79   :  { %p4856_p8 = pnand %p4854_p7, %p4851_p6 }
  0x7b   :  { %4859 = shalt.err (!%p4856_p8)
}
  0x7c   :  { %s4860_s22 = scalar_lea.vmem %s88_s30, 9216  ;;  %p4865_p10 = scmp.lt.s32.totalorder %s88_s30, %s88_s30 }
  0x7d   :  { %p4861_p9 = scmp.ne.s32.totalorder %s88_s30, %s4860_s22  ;;  %p4866_p11 = scmp.lt.s32.totalorder %s4860_s22, %s4860_s22 }
  0x7f   :  { %p4867_p12 = por %p4866_p11, %p4865_p10 }
  0x81   :  { %p4868_p13 = pnand %p4867_p12, %p4861_p9 }
  0x83   :  { %4871 = shalt.err (!%p4868_p13)
}
  0x84   :  { %s5011_s3 = smov 192   ;;  %s5012_s18 = smov 12  }
  0x85   :  { %93 = dma.hbm_to_vmem [thread:$0]  %s5524_s7, 9216, %s88_s30, [#allocation9], %s5011_s3, %s5011_s3, %s5012_s18  }
  0x86   :  { %s5013_s21 = smov [#allocation13]   ;;  %s5014_s19 = smov [#allocation16]  }
  0x87   :  { %s113_s27 = sshll.u32 %s5013_s21, 4  ;;  %s139_s25 = sshll.u32 %s5014_s19, 4  ;;  %s114_s27 = int_to_ptr.vmem [resolvable:$true] %s113_s27  ;;  %s140_s25 = int_to_ptr.vmem [resolvable:$true] %s139_s25 }
  0x88   :  { %s4872_s0 = scalar_lea.hbm %s5527_s10, 3072 }
  0x89   :  { %p4873_p0 = scmp.ne.s32.totalorder %s5527_s10, %s4872_s0  ;;  %p4876_p1 = scmp.lt.u32.totalorder %s4872_s0, %s5527_s10 }
  0x8b   :  { %p4878_p2 = pnand %p4876_p1, %p4873_p0 }
  0x8d   :  { %4881 = shalt.err (!%p4878_p2)
}
  0x8e   :  { %s4882_s7 = scalar_lea.vmem %s114_s27, 3072  ;;  %p4887_p4 = scmp.lt.s32.totalorder %s114_s27, %s114_s27 }
  0x8f   :  { %p4883_p3 = scmp.ne.s32.totalorder %s114_s27, %s4882_s7  ;;  %p4888_p5 = scmp.lt.s32.totalorder %s4882_s7, %s4882_s7 }
  0x91   :  { %p4889_p6 = por %p4888_p5, %p4887_p4 }
  0x93   :  { %p4890_p7 = pnand %p4889_p6, %p4883_p3 }
  0x95   :  { %4893 = shalt.err (!%p4890_p7)
}
  0x96   :  { %s5549_s30 = smov 4   ;;  %s5550_s23 = smov 64  }
  0x97   :  { %119 = dma.hbm_to_vmem [thread:$0]  %s5527_s10, 3072, %s114_s27, [#allocation12], %s5550_s23, %s5550_s23, %s5549_s30  }
  0x98   :  { %s4894_s6 = scalar_lea.hbm %s5530_s13, 1024 }
  0x99   :  { %p4895_p8 = scmp.ne.s32.totalorder %s5530_s13, %s4894_s6  ;;  %p4898_p9 = scmp.lt.u32.totalorder %s4894_s6, %s5530_s13 }
  0x9b   :  { %p4900_p10 = pnand %p4898_p9, %p4895_p8 }
  0x9d   :  { %4903 = shalt.err (!%p4900_p10)
}
  0x9e   :  { %s4904_s29 = scalar_lea.vmem %s140_s25, 1024  ;;  %p4909_p12 = scmp.lt.s32.totalorder %s140_s25, %s140_s25 }
  0x9f   :  { %p4905_p11 = scmp.ne.s32.totalorder %s140_s25, %s4904_s29  ;;  %p4910_p13 = scmp.lt.s32.totalorder %s4904_s29, %s4904_s29 }
  0xa1   :  { %p4911_p0 = por %p4910_p13, %p4909_p12 }
  0xa3   :  { %p4912_p1 = pnand %p4911_p0, %p4905_p11 }
  0xa5   :  { %4915 = shalt.err (!%p4912_p1)
}
  0xa6   :  { %145 = dma.hbm_to_vmem [thread:$0]  %s5530_s13, 1024, %s140_s25, [#allocation15], %s5550_s23, %s5550_s23, %s5549_s30  }
  0xa7   :  { %s5015_s0 = smov [#allocation17]   ;;  %s4916_s2 = scalar_lea.hbm %s5531_s14, 1024 }
  0xa8   :  { %s151_s12 = sshll.u32 %s5015_s0, 4  ;;  %p4917_p2 = scmp.ne.s32.totalorder %s5531_s14, %s4916_s2  ;;  %s152_s12 = int_to_ptr.vmem [resolvable:$true] %s151_s12 }
  0xa9   :  { %p4920_p3 = scmp.lt.u32.totalorder %s4916_s2, %s5531_s14 }
  0xab   :  { %p4922_p4 = pnand %p4920_p3, %p4917_p2 }
  0xad   :  { %4925 = shalt.err (!%p4922_p4)
}
  0xae   :  { %s4926_s18 = scalar_lea.vmem %s152_s12, 1024  ;;  %p4931_p6 = scmp.lt.s32.totalorder %s152_s12, %s152_s12 }
  0xaf   :  { %p4927_p5 = scmp.ne.s32.totalorder %s152_s12, %s4926_s18  ;;  %p4932_p7 = scmp.lt.s32.totalorder %s4926_s18, %s4926_s18 }
  0xb1   :  { %p4933_p8 = por %p4932_p7, %p4931_p6 }
  0xb3   :  { %p4934_p9 = pnand %p4933_p8, %p4927_p5 }
  0xb5   :  { %4937 = shalt.err (!%p4934_p9)
}
  0xb6   :  { %157 = dma.hbm_to_vmem [thread:$0]  %s5531_s14, 1024, %s152_s12, [#allocation18], %s5550_s23, %s5550_s23, %s5549_s30  }
  0xb7   :  { %4982 = dma.done.wait [#allocation3], 256  }
  0xb8   :  { %4983 = vsyncadd [#allocation3], 4294967040 }
  0xb9   :  { %4984 = dma.done.wait [#allocation6], 848  }
  0xba   :  { %4985 = vsyncadd [#allocation6], 4294966448 }
  0xbb   :  { %4986 = dma.done.wait [#allocation9], 9792  }
  0xbc   :  { %4987 = vsyncadd [#allocation9], 4294957504 }
  0xbd   :  { %4988 = dma.done.wait [#allocation12], 9216  }
  0xbe   :  { %4989 = vsyncadd [#allocation12], 4294958080 }
  0xbf   :  { %4990 = dma.done.wait [#allocation15], 1056  }
  0xc0   :  { %4991 = vsyncadd [#allocation15], 4294966240 }
  0xc1   :  { %4992 = dma.done.wait [#allocation18], 1024  }
  0xc2   :  { %4993 = vsyncadd [#allocation18], 4294966272  ;;  %vm215_vm0 = vcmask 539648   ;;  %v2766_v0 = vld [vmem:[%s5521_s4] sm:$0xff]   ;;  %v3037_v1 = vld [vmem:[%s5521_s4 + $0x8] sm:$0xff]   ;;  %vm222_vm1 = vcmask 1041408  }
  0xc3   :  { %3734 = vmatprep.subr.bf16.mxu0 %v2766_v0  ;;  %v5265_v2 = vld [vmem:[#allocation2] sm:$0xff]  ;;  %v3040_v4 = vld [vmem:[%s5522_s5 + $0x8] sm:$0xff]   ;;  %v3038_v5 = vld [vmem:[%s5521_s4 + $0x10] sm:$0xff]   ;;  %vm326_vm2 = vcmask 523264   ;;  %vm408_vm3 = vcmask 179200   ;;  %vm440_vm4 = vcmask 1045504  }
  0xc4   :  { %3736 = vmatpush3.bf16.msra.mxu0 %v2766_v0  ;;  %3331 = vmatprep.mubr.msk.f32.mxu0 %vm215_vm0, %v5265_v2  ;;  %v2782_v3 = vld [vmem:[%s5522_s5] sm:$0xff]   ;;  %v3041_v6 = vld [vmem:[%s5522_s5 + $0x10] sm:$0xff]   ;;  %v3039_v7 = vld [vmem:[%s5521_s4 + $0x18] sm:$0xff]  }
  0xc5   :  { %3738 = vmatprep.subr.bf16.mxu0 %v3037_v1  ;;  %3750 = vmatprep.subr.bf16.mxu1 %v2782_v3  ;;  %v198_v8 = vld [vmem:[%s5521_s4 + $0x20] sm:$0x1]  ;;  %v5287_v10 = vld [vmem:[#allocation2 + $0x8] sm:$0xff]  ;;  %v3042_v11 = vld [vmem:[%s5522_s5 + $0x18] sm:$0xff]  }
  0xc6   :  { %3752 = vmatpush3.bf16.msra.mxu1 %v2782_v3  ;;  %v207_v9 = vunpack.c.l.bf16 %v198_v8  ;;  %v2729_v12 = vld [vmem:[#allocation7] ss:$0 sm:$0xff]  ;;  %v2733_v19 = vld [vmem:[#allocation7 + $0x1] ss:$0 sm:$0xff]  ;;  %v432_v37 = vld [vmem:[%s5518_s1 + $0x8] sm:$0xff] }
  0xc7   :  { %3754 = vmatprep.subr.bf16.mxu1 %v3040_v4  ;;  %v431_v36 = vld [vmem:[%s5518_s1] sm:$0xff]  ;;  %v433_v39 = vld [vmem:[%s5518_s1 + $0x10] sm:$0x3f]  ;;  %v3044_v42 = vld [vmem:[#allocation8 + $0x10] sm:$0xff]  }
  0xc8   :  { %3740 = vmatpush3.bf16.msra.mxu0 %v3037_v1  ;;  %v3765_v38 = vpack.c.bf16 %v432_v37, %v431_v36  ;;  %v2798_v40 = vld [vmem:[#allocation8] sm:$0xff]   ;;  %v3043_v41 = vld [vmem:[#allocation8 + $0x8] sm:$0xff]   ;;  %v3045_v43 = vld [vmem:[#allocation8 + $0x18] sm:$0xff]  }
  0xc9   :  { %3742 = vmatprep.subr.bf16.mxu0 %v3038_v5  ;;  %v529_v50 = vld [vmem:[#allocation8 + $0x20] sm:$0x1]  ;;  %v4498_v52 = vld [vmem:[#allocation10 + $0x4] ss:$12 sps:$4 sm:$0xff]   ;;  %v4500_v53 = vld [vmem:[#allocation10] ss:$12 sps:$4 sm:$0xff]  }
  0xca   :  { %3756 = vmatpush3.bf16.msra.mxu1 %v3040_v4  ;;  %v538_v51 = vunpack.c.l.bf16 %v529_v50  ;;  %v4501_v54 = vld [vmem:[#allocation10 + $0x8] ss:$12 sps:$4 sm:$0xff]   ;;  %v4504_v56 = vld [vmem:[#allocation10 + $0x18] ss:$12 sps:$4 sm:$0xff]   ;;  %v4508_v58 = vld [vmem:[#allocation10 + $0x30] ss:$12 sps:$4 sm:$0xff]  }
  0xcb   :  { %3758 = vmatprep.subr.bf16.mxu1 %v3041_v6  ;;  %v4502_v55 = vld [vmem:[#allocation10 + $0x1c] ss:$12 sps:$4 sm:$0xff]   ;;  %v4506_v57 = vld [vmem:[#allocation10 + $0x34] ss:$12 sps:$4 sm:$0xff]   ;;  %v4510_v59 = vld [vmem:[#allocation10 + $0x4c] ss:$12 sps:$4 sm:$0xff]  }
  0xcc   :  { %3744 = vmatpush3.bf16.msra.mxu0 %v3038_v5  ;;  %v4512_v60 = vld [vmem:[#allocation10 + $0x48] ss:$12 sps:$4 sm:$0xff]   ;;  %v4514_v61 = vld [vmem:[#allocation10 + $0x64] ss:$12 sps:$4 sm:$0xff]   ;;  %v4516_v62 = vld [vmem:[#allocation10 + $0x60] ss:$12 sps:$4 sm:$0xff]  }
  0xcd   :  { %3746 = vmatprep.subr.bf16.mxu0 %v3039_v7  ;;  %v4518_v63 = vld [vmem:[#allocation10 + $0x7c] ss:$12 sps:$4 sm:$0xff]   ;;  %v4520_v0 = vld [vmem:[#allocation10 + $0x78] ss:$12 sps:$4 sm:$0xff]   ;;  %v4522_v1 = vld [vmem:[#allocation10 + $0x94] ss:$12 sps:$4 sm:$0xff]  }
  0xce   :  { %3760 = vmatpush3.bf16.msra.mxu1 %v3041_v6  ;;  %v4524_v3 = vld [vmem:[#allocation10 + $0x90] ss:$12 sps:$4 sm:$0xff]   ;;  %v4526_v4 = vld [vmem:[#allocation10 + $0xac] ss:$12 sps:$4 sm:$0xff]   ;;  %v4528_v5 = vld [vmem:[#allocation10 + $0xa8] ss:$12 sps:$4 sm:$0xff]  }
  0xcf   :  { %3762 = vmatprep.subr.bf16.mxu1 %v3042_v11  ;;  %v4548_v36 = vld [vmem:[#allocation11 + $0x64] ss:$8 sps:$4 sm:$0xff]   ;;  %v4550_v37 = vld [vmem:[#allocation11 + $0x60] ss:$8 sps:$4 sm:$0xff]  }
  0xd0   :  { %3748 = vmatpush3.bf16.msra.mxu0 %v3039_v7  ;;  %v3054_v50 = vld [vmem:[%s5528_s11 + $0x10] sm:$0xff]  }
  0xd1   :  { %3329 = vmatprep.subr.msk.mxu0 %vm222_vm1, %v207_v9 }
  0xd2   :  { %3764 = vmatpush3.bf16.msra.mxu1 %v3042_v11  ;;  %v4505_v11 = vld [vmem:[#allocation10 + $0x20] ss:$12 sps:$4 sm:$0xff]  }
  0xd3   :  { %3766 = vmatprep.subr.bf16.mxu1 %v3765_v38 }
  0xd4   :  { %3330 = vmatpush3.msk.msra.mxu0 %vm222_vm1, %v207_v9 }
  0xd5   :  { %3332 = vmatmul.mubr.msk.f32.vlgmr.msra.gmra.mrb[0].mxu0 %vm215_vm0, %v5287_v10  ;;  %3770 = vmatprep.subr.bf16.mxu0 %v2798_v40 }
  0xd6   :  { %3772 = vmatpush3.bf16.msra.mxu0 %v2798_v40  ;;  %v5328_v40 = vld [vmem:[#allocation5] sm:$0xff] }
  0xd7   :  { %3774 = vmatprep.subr.bf16.mxu0 %v3043_v41 }
  0xda   :  { %3776 = vmatpush3.bf16.msra.mxu0 %v3043_v41  ;;  %v5332_v41 = vld [vmem:[#allocation5 + $0x8] sm:$0xff] }
  0xdb   :  { %3778 = vmatprep.subr.bf16.mxu0 %v3044_v42 }
  0xde   :  { %3780 = vmatpush3.bf16.msra.mxu0 %v3044_v42  ;;  %v3047_v42 = vld [vmem:[#allocation13 + $0x10] sm:$0xff]  }
  0xdf   :  { %3782 = vmatprep.subr.bf16.mxu0 %v3045_v43 }
  0xe2   :  { %3784 = vmatpush3.bf16.msra.mxu0 %v3045_v43  ;;  %v3048_v43 = vld [vmem:[#allocation13 + $0x18] sm:$0xff]  }
  0xe3   :  { %3378 = vmatprep.subr.msk.mxu0 %vm222_vm1, %v538_v51 }
  0xe6   :  { %3379 = vmatpush3.msk.msra.mxu0 %vm222_vm1, %v538_v51  ;;  %v714_v51 = vlaneseq }
  0xe7   :  { %3818 = vmatprep.subr.bf16.mxu0 %v4501_v54 }
 0x1a8   :  { %v3333_v13 = vpop.f32.mrb[0].mxu0 }
 0x1a9   :  { %v298_v14 = vadd.f32 %v3333_v13, %v2729_v12  ;;  %v292_v15 = vpop.f32.mrb[1].mxu0  ;;  %v4513_v13 = vld [vmem:[#allocation10 + $0x50] ss:$12 sps:$4 sm:$0xff]  }
 0x1aa   :  { %v293_v16 = vadd.f32 %v2729_v12, %v292_v15  ;;  %v4509_v12 = vld [vmem:[#allocation10 + $0x38] ss:$12 sps:$4 sm:$0xff]   ;;  %v4521_v15 = vld [vmem:[#allocation10 + $0x80] ss:$12 sps:$4 sm:$0xff]  }
 0x1ab   :  { %v302_v18 = vmax.f32 %v298_v14, 0.0  ;;  %v4517_v14 = vld [vmem:[#allocation10 + $0x68] ss:$12 sps:$4 sm:$0xff]  }
 0x1ac   :  { %v301_v17 = vmax.f32 %v293_v16, 0.0  ;;  %v4530_v16 = vld [vmem:[#allocation11 + $0x4] ss:$8 sps:$4 sm:$0xff]  }
 0x1ae   :  { %3350 = vmatprep.mubr.msk.f32.mxu1 %vm326_vm2, %v301_v17  ;;  %v5016_v17 = vmov 0.0  }
 0x1af   :  { %3351 = vmatmul.mubr.msk.f32.vlgmr.msra.gmra.mrb[0].mxu1 %vm326_vm2, %v302_v18  ;;  %v2814_v18 = vld [vmem:[#allocation13] sm:$0xff]  }
 0x1b0   :  { %3768 = vmatpush3.bf16.msra.mxu1 %v3765_v38  ;;  %v4551_v38 = vld [vmem:[#allocation11 + $0x74] ss:$8 sps:$4 sm:$0xff]  }
 0x1b1   :  { %3357 = vmatprep.subr.msk.mxu1 %vm440_vm4, %v433_v39 }
 0x1b4   :  { %3358 = vmatpush3.msk.msra.mxu1 %vm440_vm4, %v433_v39  ;;  %v4553_v39 = vld [vmem:[#allocation11 + $0x70] ss:$8 sps:$4 sm:$0xff]  }
 0x1b5   :  { %3786 = vmatprep.subr.bf16.mxu1 %v4498_v52  ;;  %v5344_v52 = vshrl.u32 %v714_v51, 7 }
 0x282   :  { %v3352_v20 = vpop.f32.mrb[0].mxu1 }
 0x283   :  { %v399_v21 = vpop.f32.mrb[1].mxu1  ;;  %v405_v23 = vadd.f32 %v3352_v20, %v2733_v19 }
 0x284   :  { %v400_v22 = vadd.f32 %v2733_v19, %v399_v21  ;;  %v2739_v19 = vld [vmem:[#allocation7 + $0x2] ss:$0 sm:$0xff] }
 0x285   :  { %v412_v25 = vsel %vm408_vm3, %v405_v23, -inf }
 0x286   :  { %v409_v24 = vsel %vm408_vm3, %v400_v22, -inf }
 0x287   :  { %410 = vmax.xlane.f32.xlu0 %v409_v24  ;;  %v4533_v24 = vld [vmem:[#allocation11 + $0x14] ss:$8 sps:$4 sm:$0xff]  }
 0x28b   :  { %413 = vmax.xlane.f32.xlu0 %v412_v25 }
 0x314   :  { %v411_v26 = vpop.xlane.xlu0 %410 }
 0x315   :  { %v415_v27 = vsub.f32 %v400_v22, %v411_v26  ;;  %v4532_v22 = vld [vmem:[#allocation11] ss:$8 sps:$4 sm:$0xff]   ;;  %v4535_v26 = vld [vmem:[#allocation11 + $0x10] ss:$8 sps:$4 sm:$0xff]  }
 0x317   :  { %v417_v28 = vmul.f32 1.442695, %v415_v27  ;;  %v3046_v27 = vld [vmem:[#allocation13 + $0x8] sm:$0xff]  }
 0x318   :  { %v414_v29 = vpop.xlane.xlu0 %413 }
 0x319   :  { %4666 = vpow2.f32 %v417_v28  ;;  %v416_v30 = vsub.f32 %v405_v23, %v414_v29  ;;  %v4536_v28 = vld [vmem:[#allocation11 + $0x24] ss:$8 sps:$4 sm:$0xff]   ;;  %v4538_v29 = vld [vmem:[#allocation11 + $0x20] ss:$8 sps:$4 sm:$0xff]  }
 0x31b   :  { %v419_v31 = vmul.f32 1.442695, %v416_v30  ;;  %v4539_v30 = vld [vmem:[#allocation11 + $0x34] ss:$8 sps:$4 sm:$0xff]  }
 0x31d   :  { %4668 = vpow2.f32 %v419_v31  ;;  %v4541_v31 = vld [vmem:[#allocation11 + $0x30] ss:$8 sps:$4 sm:$0xff]  }
 0x323   :  { %v4667_v32 = vpop.eup %4666 }
 0x324   :  { %v421_v33 = vsel %vm408_vm3, %v4667_v32, 0.0 }
 0x325   :  { %422 = vadd.xlane.f32.xlu1 %v421_v33  ;;  %v4544_v33 = vld [vmem:[#allocation11 + $0x40] ss:$8 sps:$4 sm:$0xff]  }
 0x327   :  { %v4669_v34 = vpop.eup %4668 }
 0x328   :  { %v424_v35 = vsel %vm408_vm3, %v4669_v34, 0.0 }
 0x329   :  { %425 = vadd.xlane.f32.xlu1 %v424_v35  ;;  %v4547_v35 = vld [vmem:[#allocation11 + $0x50] ss:$8 sps:$4 sm:$0xff]  }
 0x3b2   :  { %v423_v44 = vpop.xlane.xlu1 %422 }
 0x3b3   :  { %4670 = vrcp.f32 %v423_v44  ;;  %v3049_v44 = vld [vmem:[#allocation13 + $0x20] sm:$0xff]  }
 0x3b6   :  { %v426_v45 = vpop.xlane.xlu1 %425 }
 0x3b7   :  { %4672 = vrcp.f32 %v426_v45  ;;  %v3050_v45 = vld [vmem:[#allocation13 + $0x28] sm:$0xff]  }
 0x3bd   :  { %v4671_v46 = vpop.eup %4670 }
 0x3be   :  { %v429_v47 = vmul.f32 %v4671_v46, %v4667_v32  ;;  %v4542_v32 = vld [vmem:[#allocation11 + $0x44] ss:$8 sps:$4 sm:$0xff]   ;;  %v3051_v46 = vld [vmem:[#allocation13 + $0x30] sm:$0xff]  }
 0x3c0   :  { %3359 = vmatprep.mubr.msk.f32.mxu1 %vm408_vm3, %v429_v47  ;;  %v3052_v47 = vld [vmem:[#allocation13 + $0x38] sm:$0xff]  }
 0x3c1   :  { %v4673_v48 = vpop.eup %4672 }
 0x3c2   :  { %v430_v49 = vmul.f32 %v4673_v48, %v4669_v34  ;;  %v4545_v34 = vld [vmem:[#allocation11 + $0x54] ss:$8 sps:$4 sm:$0xff]  }
 0x3c3   :  { %v2846_v48 = vld [vmem:[%s5528_s11] sm:$0xff]  }
 0x3c4   :  { %3360 = vmatmul.mubr.msk.f32.vlgmr.msra.gmra.mrb[2].mxu1 %vm408_vm3, %v430_v49  ;;  %v3053_v49 = vld [vmem:[%s5528_s11 + $0x8] sm:$0xff]  }
 0x3c5   :  { %3788 = vmatpush1.bf16.msra.mxu1 %v4500_v53  ;;  %793 = vmatprep.mubr.f32.mxu1 %v5016_v17  ;;  %v5347_v53 = vsub.s32 1, %v5344_v52 }
 0x3c6   :  { %3790 = vmatprep.subr.bf16.mxu1 %v4502_v55 }
 0x3c9   :  { %3792 = vmatpush1.bf16.msra.mxu1 %v4504_v56 }
 0x3ca   :  { %3794 = vmatprep.subr.bf16.mxu1 %v4506_v57 }
 0x3cd   :  { %3796 = vmatpush1.bf16.msra.mxu1 %v4508_v58 }
 0x3ce   :  { %3798 = vmatprep.subr.bf16.mxu1 %v4510_v59 }
 0x3d1   :  { %3800 = vmatpush1.bf16.msra.mxu1 %v4512_v60 }
 0x3d2   :  { %3802 = vmatprep.subr.bf16.mxu1 %v4514_v61 }
 0x3d5   :  { %3804 = vmatpush1.bf16.msra.mxu1 %v4516_v62 }
 0x3d6   :  { %3806 = vmatprep.subr.bf16.mxu1 %v4518_v63 }
 0x3d9   :  { %3808 = vmatpush1.bf16.msra.mxu1 %v4520_v0 }
 0x3da   :  { %3810 = vmatprep.subr.bf16.mxu1 %v4522_v1 }
 0x3dd   :  { %3812 = vmatpush1.bf16.msra.mxu1 %v4524_v3 }
 0x3de   :  { %3814 = vmatprep.subr.bf16.mxu1 %v4526_v4 }
 0x3e1   :  { %3816 = vmatpush1.bf16.msra.mxu1 %v4528_v5 }
 0x3e2   :  { %3850 = vmatprep.subr.bf16.mxu1 %v4530_v16  ;;  %v4558_v16 = vld [vmem:[#allocation10 + $0xdc] ss:$12 sps:$4 sm:$0xff]  }
 0x497   :  { %v3361_v6 = vpop.f32.mrb[2].mxu1 }
 0x498   :  { %v510_v7 = vpop.f32.mrb[3].mxu1  ;;  %v520_v9 = vmul.f32 %v3361_v6, %v5287_v10  ;;  %v4529_v10 = vld [vmem:[#allocation10 + $0xb0] ss:$12 sps:$4 sm:$0xff]  }
 0x499   :  { %v519_v8 = vmul.f32 %v510_v7, %v5265_v2  ;;  %v4525_v2 = vld [vmem:[#allocation10 + $0x98] ss:$12 sps:$4 sm:$0xff]  }
 0x49b   :  { %3380 = vmatprep.mubr.msk.f32.mxu0 %vm215_vm0, %v519_v8 }
 0x49c   :  { %3381 = vmatmul.mubr.msk.f32.vlgmr.msra.gmra.mrb[2].mxu0 %vm215_vm0, %v520_v9  ;;  %v3055_v9 = vld [vmem:[%s5528_s11 + $0x18] sm:$0xff]  }
 0x49d   :  { %3820 = vmatpush3.bf16.msra.mxu0 %v4501_v54  ;;  %v5352_v54 = vld [vmem:[%s5525_s8] sm:$0x7] }
 0x49e   :  { %3822 = vmatprep.subr.bf16.mxu0 %v4505_v11  ;;  %v721_v55 = vrot.slane %v5352_v54, %v5347_v53 }
 0x4a1   :  { %3824 = vmatpush3.bf16.msra.mxu0 %v4505_v11  ;;  %v3056_v11 = vld [vmem:[%s5528_s11 + $0x20] sm:$0xff]  }
 0x4a2   :  { %3826 = vmatprep.subr.bf16.mxu0 %v4509_v12 }
 0x4a5   :  { %3828 = vmatpush3.bf16.msra.mxu0 %v4509_v12  ;;  %v3057_v12 = vld [vmem:[%s5528_s11 + $0x28] sm:$0xff]  }
 0x4a6   :  { %3830 = vmatprep.subr.bf16.mxu0 %v4513_v13 }
 0x4a9   :  { %3832 = vmatpush3.bf16.msra.mxu0 %v4513_v13  ;;  %v3058_v13 = vld [vmem:[%s5528_s11 + $0x30] sm:$0xff]  }
 0x4aa   :  { %3834 = vmatprep.subr.bf16.mxu0 %v4517_v14 }
 0x4ad   :  { %3836 = vmatpush3.bf16.msra.mxu0 %v4517_v14  ;;  %v3059_v14 = vld [vmem:[%s5528_s11 + $0x38] sm:$0xff]  }
 0x4ae   :  { %3838 = vmatprep.subr.bf16.mxu0 %v4521_v15 }
 0x4b1   :  { %3840 = vmatpush3.bf16.msra.mxu0 %v4521_v15  ;;  %v4554_v15 = vld [vmem:[#allocation10 + $0xc4] ss:$12 sps:$4 sm:$0xff]  }
 0x4b2   :  { %3842 = vmatprep.subr.bf16.mxu0 %v4525_v2 }
 0x4b5   :  { %3844 = vmatpush3.bf16.msra.mxu0 %v4525_v2  ;;  %v4556_v2 = vld [vmem:[#allocation10 + $0xc0] ss:$12 sps:$4 sm:$0xff]  }
 0x4b6   :  { %3846 = vmatprep.subr.bf16.mxu0 %v4529_v10 }
 0x4b9   :  { %3848 = vmatpush3.bf16.msra.mxu0 %v4529_v10  ;;  %v5378_v10 = vld [vmem:[#allocation10 + $0xc8] ss:$12 sps:$4 sm:$0xff]  }
 0x4ba   :  { %3882 = vmatprep.subr.bf16.mxu0 %v2814_v18 }
 0x56f   :  { %v3382_v20 = vpop.f32.mrb[2].mxu0 }
 0x570   :  { %v621_v21 = vpop.f32.mrb[3].mxu0  ;;  %v5320_v25 = vadd.f32 %v3382_v20, %v2739_v19  ;;  %v4564_v20 = vld [vmem:[#allocation10 + $0xf0] ss:$12 sps:$4 sm:$0xff]  }
 0x571   :  { %v5318_v23 = vadd.f32 %v2739_v19, %v621_v21  ;;  %v4562_v19 = vld [vmem:[#allocation10 + $0xf4] ss:$12 sps:$4 sm:$0xff]   ;;  %v4566_v21 = vld [vmem:[#allocation10 + $0x10c] ss:$12 sps:$4 sm:$0xff]  }
 0x573   :  { %794 = vmatmul.mubr.f32.vlgmr.msra.gmra.mrb[4].mxu1 %v5318_v23  ;;  %3415 = vmatprep.mubr.f32.mxu0 %v5318_v23 }
 0x574   :  { %3852 = vmatpush1.bf16.msra.mxu1 %v4532_v22  ;;  %3416 = vmatmul.mubr.f32.vlgmr.msra.gmra.mrb[4].mxu0 %v5320_v25  ;;  %v4568_v22 = vld [vmem:[#allocation10 + $0x108] ss:$12 sps:$4 sm:$0xff]  }
 0x575   :  { %799 = vmatprep.mubr.f32.mxu1 %v5016_v17  ;;  %3854 = vmatprep.subr.bf16.mxu1 %v4533_v24  ;;  %v4570_v24 = vld [vmem:[#allocation10 + $0x124] ss:$12 sps:$4 sm:$0xff]  }
 0x576   :  { %3884 = vmatpush3.bf16.msra.mxu0 %v2814_v18  ;;  %v4560_v18 = vld [vmem:[#allocation10 + $0xd8] ss:$12 sps:$4 sm:$0xff]  }
 0x577   :  { %800 = vmatmul.mubr.f32.gmra.mrb[6].mxu1 %v5320_v25  ;;  %3886 = vmatprep.subr.bf16.mxu0 %v3046_v27 }
 0x578   :  { %3856 = vmatpush1.bf16.msra.mxu1 %v4535_v26  ;;  %993 = vmatprep.mubr.f32.mxu1 %v5016_v17  ;;  %v4572_v26 = vld [vmem:[#allocation10 + $0x120] ss:$12 sps:$4 sm:$0xff]  }
 0x579   :  { %3858 = vmatprep.subr.bf16.mxu1 %v4536_v28  ;;  %v4576_v28 = vld [vmem:[#allocation10 + $0x138] ss:$12 sps:$4 sm:$0xff]  }
 0x57a   :  { %3888 = vmatpush3.bf16.msra.mxu0 %v3046_v27  ;;  %v4574_v27 = vld [vmem:[#allocation10 + $0x13c] ss:$12 sps:$4 sm:$0xff]  }
 0x57b   :  { %3890 = vmatprep.subr.bf16.mxu0 %v3047_v42 }
 0x57c   :  { %3860 = vmatpush1.bf16.msra.mxu1 %v4538_v29  ;;  %v4578_v29 = vld [vmem:[#allocation10 + $0x154] ss:$12 sps:$4 sm:$0xff]  }
 0x57d   :  { %3862 = vmatprep.subr.bf16.mxu1 %v4539_v30  ;;  %v4580_v30 = vld [vmem:[#allocation10 + $0x150] ss:$12 sps:$4 sm:$0xff]  }
 0x57e   :  { %3892 = vmatpush3.bf16.msra.mxu0 %v3047_v42 }
 0x57f   :  { %3894 = vmatprep.subr.bf16.mxu0 %v3048_v43 }
 0x580   :  { %3864 = vmatpush1.bf16.msra.mxu1 %v4541_v31  ;;  %v5382_v31 = vsub.s32 0, %v5344_v52 }
 0x581   :  { %3866 = vmatprep.subr.bf16.mxu1 %v4542_v32 }
 0x582   :  { %3896 = vmatpush3.bf16.msra.mxu0 %v3048_v43  ;;  %v717_v32 = vrot.slane %v5352_v54, %v5382_v31 }
 0x583   :  { %3898 = vmatprep.subr.bf16.mxu0 %v3049_v44 }
 0x584   :  { %3868 = vmatpush1.bf16.msra.mxu1 %v4544_v33 }
 0x585   :  { %3870 = vmatprep.subr.bf16.mxu1 %v4545_v34 }
 0x586   :  { %3900 = vmatpush3.bf16.msra.mxu0 %v3049_v44 }
 0x587   :  { %3902 = vmatprep.subr.bf16.mxu0 %v3050_v45 }
 0x588   :  { %3872 = vmatpush1.bf16.msra.mxu1 %v4547_v35 }
 0x589   :  { %3874 = vmatprep.subr.bf16.mxu1 %v4548_v36 }
 0x58a   :  { %3904 = vmatpush3.bf16.msra.mxu0 %v3050_v45 }
 0x58b   :  { %3906 = vmatprep.subr.bf16.mxu0 %v3051_v46 }
 0x58c   :  { %3876 = vmatpush1.bf16.msra.mxu1 %v4550_v37  ;;  %v5389_v37 = vsub.s32 2, %v5344_v52 }
 0x58d   :  { %3878 = vmatprep.subr.bf16.mxu1 %v4551_v38 }
 0x58e   :  { %3908 = vmatpush3.bf16.msra.mxu0 %v3051_v46  ;;  %v725_v38 = vrot.slane %v5352_v54, %v5389_v37 }
 0x58f   :  { %3910 = vmatprep.subr.bf16.mxu0 %v3052_v47 }
 0x590   :  { %3880 = vmatpush1.bf16.msra.mxu1 %v4553_v39 }
 0x591   :  { %3914 = vmatprep.subr.bf16.mxu1 %v2846_v48 }
 0x592   :  { %3912 = vmatpush3.bf16.msra.mxu0 %v3052_v47 }
 0x593   :  { %994 = vmatmul.mubr.f32.vlgmr.msra.gmra.mrb[4].mxu1 %v5328_v40  ;;  %3946 = vmatprep.subr.bf16.mxu0 %v4554_v15 }
 0x594   :  { %999 = vmatprep.mubr.f32.mxu1 %v5016_v17  ;;  %3916 = vmatpush3.bf16.msra.mxu1 %v2846_v48 }
 0x595   :  { %3918 = vmatprep.subr.bf16.mxu1 %v3053_v49 }
 0x597   :  { %1000 = vmatmul.mubr.f32.gmra.mrb[6].mxu1 %v5332_v41 }
 0x598   :  { %3920 = vmatpush3.bf16.msra.mxu1 %v3053_v49 }
 0x599   :  { %3922 = vmatprep.subr.bf16.mxu1 %v3054_v50 }
 0x59c   :  { %3924 = vmatpush3.bf16.msra.mxu1 %v3054_v50 }
 0x59d   :  { %3926 = vmatprep.subr.bf16.mxu1 %v3055_v9 }
 0x5a0   :  { %3928 = vmatpush3.bf16.msra.mxu1 %v3055_v9 }
 0x5a1   :  { %3930 = vmatprep.subr.bf16.mxu1 %v3056_v11 }
 0x5a4   :  { %3932 = vmatpush3.bf16.msra.mxu1 %v3056_v11  ;;  %v2743_v11 = vld [vmem:[#allocation14] ss:$0 sm:$0xff] }
 0x5a5   :  { %3934 = vmatprep.subr.bf16.mxu1 %v3057_v12 }
 0x5a8   :  { %3936 = vmatpush3.bf16.msra.mxu1 %v3057_v12 }
 0x5a9   :  { %3938 = vmatprep.subr.bf16.mxu1 %v3058_v13 }
 0x5ac   :  { %3940 = vmatpush3.bf16.msra.mxu1 %v3058_v13 }
 0x5ad   :  { %3942 = vmatprep.subr.bf16.mxu1 %v3059_v14 }
 0x5b0   :  { %3944 = vmatpush3.bf16.msra.mxu1 %v3059_v14  ;;  %v4588_v14 = vld [vmem:[#allocation11 + $0x80] ss:$8 sps:$4 sm:$0xff]  }
 0x5b1   :  { %3978 = vmatprep.subr.bf16.mxu1 %v5378_v10 }
 0x666   :  { %v5356_v56 = vpop.f32.mrb[4].mxu1 }
 0x667   :  { %v997_v57 = vpop.f32.mrb[5].mxu1  ;;  %v4297_v34 = vadd.f32 %v5356_v56, %v717_v32 }
 0x668   :  { %v4298_v58 = vadd.f32 %v997_v57, %v721_v55 }
 0x669   :  { %v1008_v36 = vmul.f32 0.5, %v4297_v34  ;;  %v3061_v34 = vld [vmem:[#allocation13 + $0x50] sm:$0xff]  }
 0x66a   :  { %v1018_v59 = vmul.f32 0.5, %v4298_v58  ;;  %v5358_v60 = vpop.f32.mrb[6].mxu1 }
 0x66b   :  { %v1003_v61 = vpop.f32.mrb[7].mxu1  ;;  %v4299_v33 = vadd.f32 %v5358_v60, %v717_v32  ;;  %v5408_v32 = vld [vmem:[#allocation5 + $0x10] sm:$0xff] }
 0x66c   :  { %4674 = vtanh.f32 %v1018_v59  ;;  %v4300_v62 = vadd.f32 %v1003_v61, %v721_v55 }
 0x66d   :  { %v1009_v35 = vmul.f32 0.5, %v4299_v33  ;;  %v5412_v33 = vld [vmem:[#allocation5 + $0x18] sm:$0xff] }
 0x66e   :  { %v1019_v63 = vmul.f32 0.5, %v4300_v62  ;;  %v4561_v62 = vld [vmem:[#allocation10 + $0xe0] ss:$12 sps:$4 sm:$0xff]  }
 0x670   :  { %4676 = vtanh.f32 %v1019_v63  ;;  %v4565_v63 = vld [vmem:[#allocation10 + $0xf8] ss:$12 sps:$4 sm:$0xff]  }
 0x671   :  { %4678 = vtanh.f32 %v1009_v35  ;;  %v3062_v35 = vld [vmem:[#allocation13 + $0x58] sm:$0xff]  }
 0x672   :  { %4680 = vtanh.f32 %v1008_v36  ;;  %v3063_v36 = vld [vmem:[#allocation13 + $0x60] sm:$0xff]  }
 0x676   :  { %v4675_v0 = vpop.eup %4674 }
 0x677   :  { %v1022_v1 = vmul.f32 0.5, %v4675_v0  ;;  %v4569_v0 = vld [vmem:[#allocation10 + $0x110] ss:$12 sps:$4 sm:$0xff]  }
 0x679   :  { %v1024_v3 = vadd.f32 0.5, %v1022_v1  ;;  %v4581_v1 = vld [vmem:[#allocation10 + $0x158] ss:$12 sps:$4 sm:$0xff]  }
 0x67a   :  { %v4677_v4 = vpop.eup %4676 }
 0x67b   :  { %v1023_v5 = vmul.f32 0.5, %v4677_v4  ;;  %v1026_v6 = vmul.f32 %v1024_v3, %v5328_v40  ;;  %v4679_v39 = vpop.eup %4678  ;;  %v4582_v3 = vld [vmem:[#allocation10 + $0x16c] ss:$12 sps:$4 sm:$0xff]   ;;  %v4584_v4 = vld [vmem:[#allocation10 + $0x168] ss:$12 sps:$4 sm:$0xff]  }
 0x67c   :  { %v4681_v42 = vpop.eup %4680  ;;  %v1013_v46 = vmul.f32 0.5, %v4679_v39  ;;  %v3065_v39 = vld [vmem:[#allocation13 + $0x70] sm:$0xff]  }
 0x67d   :  { %v1025_v7 = vadd.f32 0.5, %v1023_v5  ;;  %3450 = vmatprep.mubr.f32.mxu0 %v1026_v6  ;;  %v1012_v48 = vmul.f32 0.5, %v4681_v42  ;;  %v4585_v5 = vld [vmem:[#allocation10 + $0x170] ss:$12 sps:$4 sm:$0xff]   ;;  %v4586_v6 = vld [vmem:[#allocation11 + $0x84] ss:$8 sps:$4 sm:$0xff]  }
 0x67e   :  { %v1015_v49 = vadd.f32 0.5, %v1013_v46  ;;  %v3066_v42 = vld [vmem:[#allocation13 + $0x78] sm:$0xff]  }
 0x67f   :  { %v1027_v8 = vmul.f32 %v1025_v7, %v5332_v41  ;;  %v1014_v50 = vadd.f32 0.5, %v1012_v48  ;;  %v2878_v7 = vld [vmem:[#allocation13 + $0x40] sm:$0xff]   ;;  %v5427_v46 = vld [vmem:[%s5525_s8 + $0x3] sm:$0x7] }
 0x680   :  { %v1140_v51 = vsub.f32 1.0, %v1015_v49 }
 0x681   :  { %3451 = vmatmul.mubr.f32.vlgmr.msra.gmra.mrb[4].mxu0 %v1027_v8  ;;  %v1139_v55 = vsub.f32 1.0, %v1014_v50 }
 0x682   :  { %1433 = vmatprep.mubr.f32.mxu0 %v5016_v17  ;;  %3948 = vmatpush1.bf16.msra.mxu0 %v4556_v2  ;;  %v1142_v57 = vmul.f32 %v1140_v51, %v5332_v41  ;;  %v4573_v41 = vld [vmem:[#allocation10 + $0x128] ss:$12 sps:$4 sm:$0xff]  }
 0x683   :  { %3950 = vmatprep.subr.bf16.mxu0 %v4558_v16  ;;  %v1141_v54 = vmul.f32 %v1139_v55, %v5328_v40  ;;  %v4577_v40 = vld [vmem:[#allocation10 + $0x140] ss:$12 sps:$4 sm:$0xff]   ;;  %v4589_v2 = vld [vmem:[#allocation11 + $0x94] ss:$8 sps:$4 sm:$0xff]   ;;  %v4591_v16 = vld [vmem:[#allocation11 + $0x90] ss:$8 sps:$4 sm:$0xff]  }
 0x686   :  { %3952 = vmatpush1.bf16.msra.mxu0 %v4560_v18  ;;  %v3060_v18 = vld [vmem:[#allocation13 + $0x48] sm:$0xff]  }
 0x687   :  { %3954 = vmatprep.subr.bf16.mxu0 %v4562_v19  ;;  %v4595_v19 = vld [vmem:[#allocation11 + $0xb4] ss:$8 sps:$4 sm:$0xff]  }
 0x68a   :  { %3956 = vmatpush1.bf16.msra.mxu0 %v4564_v20  ;;  %v4597_v20 = vld [vmem:[#allocation11 + $0xb0] ss:$8 sps:$4 sm:$0xff]  }
 0x68b   :  { %3958 = vmatprep.subr.bf16.mxu0 %v4566_v21  ;;  %v4598_v21 = vld [vmem:[#allocation11 + $0xc4] ss:$8 sps:$4 sm:$0xff]  }
 0x68e   :  { %3960 = vmatpush1.bf16.msra.mxu0 %v4568_v22  ;;  %v4600_v22 = vld [vmem:[#allocation11 + $0xc0] ss:$8 sps:$4 sm:$0xff]  }
 0x68f   :  { %3962 = vmatprep.subr.bf16.mxu0 %v4570_v24  ;;  %v4601_v24 = vld [vmem:[#allocation11 + $0xd4] ss:$8 sps:$4 sm:$0xff]  }
 0x692   :  { %3964 = vmatpush1.bf16.msra.mxu0 %v4572_v26  ;;  %v4603_v26 = vld [vmem:[#allocation11 + $0xd0] ss:$8 sps:$4 sm:$0xff]  }
 0x693   :  { %3966 = vmatprep.subr.bf16.mxu0 %v4574_v27  ;;  %v4604_v27 = vld [vmem:[#allocation11 + $0xe4] ss:$8 sps:$4 sm:$0xff]  }
 0x696   :  { %3968 = vmatpush1.bf16.msra.mxu0 %v4576_v28  ;;  %v4606_v28 = vld [vmem:[#allocation11 + $0xe0] ss:$8 sps:$4 sm:$0xff]  }
 0x697   :  { %3970 = vmatprep.subr.bf16.mxu0 %v4578_v29  ;;  %v4607_v29 = vld [vmem:[#allocation11 + $0xf4] ss:$8 sps:$4 sm:$0xff]  }
 0x69a   :  { %3972 = vmatpush1.bf16.msra.mxu0 %v4580_v30  ;;  %v4609_v30 = vld [vmem:[#allocation11 + $0xf0] ss:$8 sps:$4 sm:$0xff]  }
 0x69b   :  { %3974 = vmatprep.subr.bf16.mxu0 %v4582_v3  ;;  %v3073_v3 = vld [vmem:[%s5528_s11 + $0x70] sm:$0xff]  }
 0x69e   :  { %3976 = vmatpush1.bf16.msra.mxu0 %v4584_v4  ;;  %v3074_v4 = vld [vmem:[%s5528_s11 + $0x78] sm:$0xff]  }
 0x69f   :  { %4010 = vmatprep.subr.bf16.mxu0 %v4586_v6  ;;  %v4612_v6 = vld [vmem:[#allocation10 + $0x180] ss:$12 sps:$4 sm:$0xff]  }
 0x754   :  { %v3452_v43 = vpop.f32.mrb[4].mxu0 }
 0x755   :  { %v4301_v44 = vadd.f32 %v3452_v43, %v725_v38  ;;  %v1126_v45 = vpop.f32.mrb[5].mxu0  ;;  %v3067_v43 = vld [vmem:[%s5528_s11 + $0x40] sm:$0xff]  }
 0x756   :  { %v4302_v47 = vadd.f32 %v1126_v45, %v725_v38  ;;  %v3064_v38 = vld [vmem:[#allocation13 + $0x68] sm:$0xff]  }
 0x757   :  { %4682 = vtanh.f32 %v4301_v44  ;;  %v3068_v44 = vld [vmem:[%s5528_s11 + $0x48] sm:$0xff]   ;;  %v3069_v45 = vld [vmem:[%s5528_s11 + $0x50] sm:$0xff]  }
 0x758   :  { %4684 = vtanh.f32 %v4302_v47  ;;  %v1361_v47 = vrot.slane %v5427_v46, %v5347_v53 }
 0x761   :  { %v4683_v56 = vpop.eup %4682 }
 0x762   :  { %v4685_v52 = vpop.eup %4684  ;;  %v1144_v58 = vmul.f32 %v4683_v56, %v1015_v49 }
 0x763   :  { %v1143_v59 = vmul.f32 %v4685_v52, %v1014_v50 }
 0x764   :  { %v1146_v60 = vadd.f32 %v1144_v58, %v1142_v57 }
 0x765   :  { %v1145_v61 = vadd.f32 %v1143_v59, %v1141_v54 }
 0x766   :  { %1148 = vst [vmem:[#allocation20 + $0x8] sm:$0xff] %v1146_v60 }
 0x767   :  { %1147 = vst [vmem:[#allocation20] sm:$0xff] %v1145_v61  ;;  %3485 = vmatprep.mubr.f32.mxu1 %v1145_v61 }
 0x768   :  { %3486 = vmatmul.mubr.f32.vlgmr.msra.gmra.mrb[8].mxu1 %v1146_v60 }
 0x769   :  { %3980 = vmatpush3.bf16.msra.mxu1 %v5378_v10 }
 0x76a   :  { %3982 = vmatprep.subr.bf16.mxu1 %v4561_v62 }
 0x76d   :  { %3984 = vmatpush3.bf16.msra.mxu1 %v4561_v62 }
 0x76e   :  { %3986 = vmatprep.subr.bf16.mxu1 %v4565_v63 }
 0x771   :  { %3988 = vmatpush3.bf16.msra.mxu1 %v4565_v63 }
 0x772   :  { %3990 = vmatprep.subr.bf16.mxu1 %v4569_v0 }
 0x775   :  { %3992 = vmatpush3.bf16.msra.mxu1 %v4569_v0 }
 0x776   :  { %3994 = vmatprep.subr.bf16.mxu1 %v4573_v41 }
 0x779   :  { %3996 = vmatpush3.bf16.msra.mxu1 %v4573_v41  ;;  %v3070_v41 = vld [vmem:[%s5528_s11 + $0x58] sm:$0xff]  }
 0x77a   :  { %3998 = vmatprep.subr.bf16.mxu1 %v4577_v40 }
 0x77d   :  { %4000 = vmatpush3.bf16.msra.mxu1 %v4577_v40  ;;  %v3071_v40 = vld [vmem:[%s5528_s11 + $0x60] sm:$0xff]  }
 0x77e   :  { %4002 = vmatprep.subr.bf16.mxu1 %v4581_v1 }
 0x781   :  { %4004 = vmatpush3.bf16.msra.mxu1 %v4581_v1  ;;  %v3072_v1 = vld [vmem:[%s5528_s11 + $0x68] sm:$0xff]  }
 0x782   :  { %4006 = vmatprep.subr.bf16.mxu1 %v4585_v5 }
 0x785   :  { %4008 = vmatpush3.bf16.msra.mxu1 %v4585_v5  ;;  %v4610_v5 = vld [vmem:[#allocation10 + $0x184] ss:$12 sps:$4 sm:$0xff]  }
 0x786   :  { %4042 = vmatprep.subr.bf16.mxu1 %v2878_v7 }
 0x83b   :  { %v3487_v8 = vpop.f32.mrb[8].mxu1 }
 0x83c   :  { %v1257_v9 = vadd.f32 %v3487_v8, %v5320_v25  ;;  %v1247_v12 = vpop.f32.mrb[9].mxu1  ;;  %v4592_v25 = vld [vmem:[#allocation11 + $0xa4] ss:$8 sps:$4 sm:$0xff]   ;;  %v4614_v8 = vld [vmem:[#allocation10 + $0x19c] ss:$12 sps:$4 sm:$0xff]  }
 0x83d   :  { %v1256_v13 = vadd.f32 %v1247_v12, %v5318_v23  ;;  %v4594_v23 = vld [vmem:[#allocation11 + $0xa0] ss:$8 sps:$4 sm:$0xff]   ;;  %v4620_v12 = vld [vmem:[#allocation10 + $0x1b0] ss:$12 sps:$4 sm:$0xff]  }
 0x83e   :  { %v5400_v10 = vadd.f32 %v2743_v11, %v1257_v9  ;;  %v4616_v9 = vld [vmem:[#allocation10 + $0x198] ss:$12 sps:$4 sm:$0xff]  }
 0x83f   :  { %v5398_v15 = vadd.f32 %v2743_v11, %v1256_v13  ;;  %v4618_v11 = vld [vmem:[#allocation10 + $0x1b4] ss:$12 sps:$4 sm:$0xff]   ;;  %v4622_v13 = vld [vmem:[#allocation10 + $0x1cc] ss:$12 sps:$4 sm:$0xff]  }
 0x841   :  { %1434 = vmatmul.mubr.f32.vlgmr.msra.gmra.mrb[6].mxu0 %v5398_v15  ;;  %3520 = vmatprep.mubr.f32.mxu1 %v5398_v15 }
 0x842   :  { %4012 = vmatpush1.bf16.msra.mxu0 %v4588_v14  ;;  %3521 = vmatmul.mubr.f32.vlgmr.msra.gmra.mrb[10].mxu1 %v5400_v10  ;;  %v4624_v14 = vld [vmem:[#allocation10 + $0x1c8] ss:$12 sps:$4 sm:$0xff]  }
 0x843   :  { %1439 = vmatprep.mubr.f32.mxu0 %v5016_v17  ;;  %4014 = vmatprep.subr.bf16.mxu0 %v4589_v2  ;;  %v4626_v2 = vld [vmem:[#allocation10 + $0x1e4] ss:$12 sps:$4 sm:$0xff]  }
 0x844   :  { %4044 = vmatpush3.bf16.msra.mxu1 %v2878_v7  ;;  %v4613_v7 = vld [vmem:[#allocation10 + $0x188] ss:$12 sps:$4 sm:$0xff]  }
 0x845   :  { %1440 = vmatmul.mubr.f32.gmra.mrb[8].mxu0 %v5400_v10  ;;  %4046 = vmatprep.subr.bf16.mxu1 %v3060_v18 }
 0x846   :  { %4016 = vmatpush1.bf16.msra.mxu0 %v4591_v16  ;;  %1634 = vmatprep.mubr.f32.mxu0 %v5016_v17  ;;  %v4628_v16 = vld [vmem:[#allocation10 + $0x1e0] ss:$12 sps:$4 sm:$0xff]  }
 0x847   :  { %4018 = vmatprep.subr.bf16.mxu0 %v4592_v25  ;;  %v4632_v25 = vld [vmem:[#allocation10 + $0x1f8] ss:$12 sps:$4 sm:$0xff]  }
 0x848   :  { %4048 = vmatpush3.bf16.msra.mxu1 %v3060_v18  ;;  %v4630_v18 = vld [vmem:[#allocation10 + $0x1fc] ss:$12 sps:$4 sm:$0xff]  }
 0x849   :  { %4050 = vmatprep.subr.bf16.mxu1 %v3061_v34 }
 0x84a   :  { %4020 = vmatpush1.bf16.msra.mxu0 %v4594_v23  ;;  %v4634_v23 = vld [vmem:[#allocation10 + $0x214] ss:$12 sps:$4 sm:$0xff]  }
 0x84b   :  { %4022 = vmatprep.subr.bf16.mxu0 %v4595_v19  ;;  %v4636_v19 = vld [vmem:[#allocation10 + $0x210] ss:$12 sps:$4 sm:$0xff]  }
 0x84c   :  { %4052 = vmatpush3.bf16.msra.mxu1 %v3061_v34 }
 0x84d   :  { %4054 = vmatprep.subr.bf16.mxu1 %v3062_v35 }
 0x84e   :  { %4024 = vmatpush1.bf16.msra.mxu0 %v4597_v20  ;;  %v1357_v20 = vrot.slane %v5427_v46, %v5382_v31 }
 0x84f   :  { %4026 = vmatprep.subr.bf16.mxu0 %v4598_v21 }
 0x850   :  { %4056 = vmatpush3.bf16.msra.mxu1 %v3062_v35 }
 0x851   :  { %4058 = vmatprep.subr.bf16.mxu1 %v3063_v36 }
 0x852   :  { %4028 = vmatpush1.bf16.msra.mxu0 %v4600_v22 }
 0x853   :  { %4030 = vmatprep.subr.bf16.mxu0 %v4601_v24 }
 0x854   :  { %4060 = vmatpush3.bf16.msra.mxu1 %v3063_v36 }
 0x855   :  { %4062 = vmatprep.subr.bf16.mxu1 %v3064_v38 }
 0x856   :  { %4032 = vmatpush1.bf16.msra.mxu0 %v4603_v26 }
 0x857   :  { %4034 = vmatprep.subr.bf16.mxu0 %v4604_v27  ;;  %v1365_v27 = vrot.slane %v5427_v46, %v5389_v37 }
 0x858   :  { %4064 = vmatpush3.bf16.msra.mxu1 %v3064_v38 }
 0x859   :  { %4066 = vmatprep.subr.bf16.mxu1 %v3065_v39 }
 0x85a   :  { %4036 = vmatpush1.bf16.msra.mxu0 %v4606_v28 }
 0x85b   :  { %4038 = vmatprep.subr.bf16.mxu0 %v4607_v29 }
 0x85c   :  { %4068 = vmatpush3.bf16.msra.mxu1 %v3065_v39 }
 0x85d   :  { %4070 = vmatprep.subr.bf16.mxu1 %v3066_v42 }
 0x85e   :  { %4040 = vmatpush1.bf16.msra.mxu0 %v4609_v30 }
 0x85f   :  { %4074 = vmatprep.subr.bf16.mxu0 %v3067_v43 }
 0x860   :  { %4072 = vmatpush3.bf16.msra.mxu1 %v3066_v42 }
 0x861   :  { %1635 = vmatmul.mubr.f32.vlgmr.msra.gmra.mrb[6].mxu0 %v5408_v32  ;;  %4106 = vmatprep.subr.bf16.mxu1 %v4610_v5 }
 0x862   :  { %1640 = vmatprep.mubr.f32.mxu0 %v5016_v17  ;;  %4076 = vmatpush3.bf16.msra.mxu0 %v3067_v43 }
 0x863   :  { %4078 = vmatprep.subr.bf16.mxu0 %v3068_v44 }
 0x865   :  { %1641 = vmatmul.mubr.f32.gmra.mrb[8].mxu0 %v5412_v33 }
 0x866   :  { %4080 = vmatpush3.bf16.msra.mxu0 %v3068_v44 }
 0x867   :  { %4082 = vmatprep.subr.bf16.mxu0 %v3069_v45 }
 0x86a   :  { %4084 = vmatpush3.bf16.msra.mxu0 %v3069_v45 }
 0x86b   :  { %4086 = vmatprep.subr.bf16.mxu0 %v3070_v41 }
 0x86e   :  { %4088 = vmatpush3.bf16.msra.mxu0 %v3070_v41 }
 0x86f   :  { %4090 = vmatprep.subr.bf16.mxu0 %v3071_v40 }
 0x872   :  { %4092 = vmatpush3.bf16.msra.mxu0 %v3071_v40  ;;  %v2761_v40 = vld [vmem:[#allocation14 + $0x1] ss:$0 sm:$0xff] }
 0x873   :  { %4094 = vmatprep.subr.bf16.mxu0 %v3072_v1 }
 0x876   :  { %4096 = vmatpush3.bf16.msra.mxu0 %v3072_v1 }
 0x877   :  { %4098 = vmatprep.subr.bf16.mxu0 %v3073_v3 }
 0x87a   :  { %4100 = vmatpush3.bf16.msra.mxu0 %v3073_v3 }
 0x87b   :  { %4102 = vmatprep.subr.bf16.mxu0 %v3074_v4 }
 0x87e   :  { %4104 = vmatpush3.bf16.msra.mxu0 %v3074_v4  ;;  %v4644_v4 = vld [vmem:[#allocation11 + $0x100] ss:$8 sps:$4 sm:$0xff]  }
 0x87f   :  { %4138 = vmatprep.subr.bf16.mxu0 %v4613_v7 }
 0x934   :  { %v5431_v48 = vpop.f32.mrb[6].mxu0 }
 0x935   :  { %v1638_v49 = vpop.f32.mrb[7].mxu0  ;;  %v4303_v22 = vadd.f32 %v5431_v48, %v1357_v20 }
 0x936   :  { %v4304_v50 = vadd.f32 %v1638_v49, %v1361_v47 }
 0x937   :  { %v1649_v26 = vmul.f32 0.5, %v4303_v22  ;;  %v3076_v22 = vld [vmem:[#allocation13 + $0x90] sm:$0xff]  }
 0x938   :  { %v1659_v51 = vmul.f32 0.5, %v4304_v50  ;;  %v5433_v55 = vpop.f32.mrb[8].mxu0 }
 0x939   :  { %v1644_v56 = vpop.f32.mrb[9].mxu0  ;;  %v4305_v21 = vadd.f32 %v5433_v55, %v1357_v20  ;;  %v5465_v20 = vld [vmem:[#allocation5 + $0x20] sm:$0xff] }
 0x93a   :  { %4686 = vtanh.f32 %v1659_v51  ;;  %v4306_v52 = vadd.f32 %v1644_v56, %v1361_v47 }
 0x93b   :  { %v1650_v24 = vmul.f32 0.5, %v4305_v21  ;;  %v5469_v21 = vld [vmem:[#allocation5 + $0x28] sm:$0xff] }
 0x93c   :  { %v1660_v57 = vmul.f32 0.5, %v4306_v52  ;;  %v4617_v52 = vld [vmem:[#allocation10 + $0x1a0] ss:$12 sps:$4 sm:$0xff]  }
 0x93e   :  { %4688 = vtanh.f32 %v1660_v57  ;;  %v4621_v57 = vld [vmem:[#allocation10 + $0x1b8] ss:$12 sps:$4 sm:$0xff]  }
 0x93f   :  { %4690 = vtanh.f32 %v1650_v24  ;;  %v3077_v24 = vld [vmem:[#allocation13 + $0x98] sm:$0xff]  }
 0x940   :  { %4692 = vtanh.f32 %v1649_v26  ;;  %v3078_v26 = vld [vmem:[#allocation13 + $0xa0] sm:$0xff]  }
 0x944   :  { %v4687_v58 = vpop.eup %4686 }
 0x945   :  { %v1663_v54 = vmul.f32 0.5, %v4687_v58  ;;  %v4625_v58 = vld [vmem:[#allocation10 + $0x1d0] ss:$12 sps:$4 sm:$0xff]  }
 0x947   :  { %v1665_v59 = vadd.f32 0.5, %v1663_v54  ;;  %v4637_v54 = vld [vmem:[#allocation10 + $0x218] ss:$12 sps:$4 sm:$0xff]  }
 0x948   :  { %v4689_v60 = vpop.eup %4688 }
 0x949   :  { %v1664_v61 = vmul.f32 0.5, %v4689_v60  ;;  %v1667_v62 = vmul.f32 %v1665_v59, %v5408_v32  ;;  %v4691_v28 = vpop.eup %4690  ;;  %v4638_v59 = vld [vmem:[#allocation10 + $0x22c] ss:$12 sps:$4 sm:$0xff]   ;;  %v4640_v60 = vld [vmem:[#allocation10 + $0x228] ss:$12 sps:$4 sm:$0xff]  }
 0x94a   :  { %v4693_v29 = vpop.eup %4692  ;;  %v1654_v36 = vmul.f32 0.5, %v4691_v28  ;;  %v3080_v28 = vld [vmem:[#allocation13 + $0xb0] sm:$0xff]  }
 0x94b   :  { %v1666_v63 = vadd.f32 0.5, %v1664_v61  ;;  %3555 = vmatprep.mubr.f32.mxu1 %v1667_v62  ;;  %v1653_v39 = vmul.f32 0.5, %v4693_v29  ;;  %v4641_v61 = vld [vmem:[#allocation10 + $0x230] ss:$12 sps:$4 sm:$0xff]   ;;  %v4642_v62 = vld [vmem:[#allocation11 + $0x104] ss:$8 sps:$4 sm:$0xff]  }
 0x94c   :  { %v1656_v42 = vadd.f32 0.5, %v1654_v36  ;;  %v2974_v29 = vld [vmem:[#allocation16] sm:$0xff]  }
 0x94d   :  { %v1668_v0 = vmul.f32 %v1666_v63, %v5412_v33  ;;  %v1655_v43 = vadd.f32 0.5, %v1653_v39  ;;  %v2942_v63 = vld [vmem:[#allocation13 + $0x80] sm:$0xff]  }
 0x94e   :  { %v1782_v44 = vsub.f32 1.0, %v1656_v42 }
 0x94f   :  { %3556 = vmatmul.mubr.f32.vlgmr.msra.gmra.mrb[10].mxu1 %v1668_v0  ;;  %v1781_v45 = vsub.f32 1.0, %v1655_v43 }
 0x950   :  { %2078 = vmatprep.mubr.f32.mxu1 %v5016_v17  ;;  %4108 = vmatpush1.bf16.msra.mxu1 %v4612_v6  ;;  %v1784_v49 = vmul.f32 %v1782_v44, %v5412_v33  ;;  %v4629_v33 = vld [vmem:[#allocation10 + $0x1e8] ss:$12 sps:$4 sm:$0xff]  }
 0x951   :  { %4110 = vmatprep.subr.bf16.mxu1 %v4614_v8  ;;  %v1783_v46 = vmul.f32 %v1781_v45, %v5408_v32  ;;  %v4633_v32 = vld [vmem:[#allocation10 + $0x200] ss:$12 sps:$4 sm:$0xff]   ;;  %v4645_v6 = vld [vmem:[#allocation11 + $0x114] ss:$8 sps:$4 sm:$0xff]   ;;  %v4647_v8 = vld [vmem:[#allocation11 + $0x110] ss:$8 sps:$4 sm:$0xff]  }
 0x954   :  { %4112 = vmatpush1.bf16.msra.mxu1 %v4616_v9  ;;  %v3075_v9 = vld [vmem:[#allocation13 + $0x88] sm:$0xff]  }
 0x955   :  { %4114 = vmatprep.subr.bf16.mxu1 %v4618_v11  ;;  %v4648_v11 = vld [vmem:[#allocation11 + $0x124] ss:$8 sps:$4 sm:$0xff]  }
 0x958   :  { %4116 = vmatpush1.bf16.msra.mxu1 %v4620_v12  ;;  %v4653_v12 = vld [vmem:[#allocation11 + $0x130] ss:$8 sps:$4 sm:$0xff]  }
 0x959   :  { %4118 = vmatprep.subr.bf16.mxu1 %v4622_v13  ;;  %v4654_v13 = vld [vmem:[#allocation11 + $0x144] ss:$8 sps:$4 sm:$0xff]  }
 0x95c   :  { %4120 = vmatpush1.bf16.msra.mxu1 %v4624_v14  ;;  %v4656_v14 = vld [vmem:[#allocation11 + $0x140] ss:$8 sps:$4 sm:$0xff]  }
 0x95d   :  { %4122 = vmatprep.subr.bf16.mxu1 %v4626_v2  ;;  %v4657_v2 = vld [vmem:[#allocation11 + $0x154] ss:$8 sps:$4 sm:$0xff]  }
 0x960   :  { %4124 = vmatpush1.bf16.msra.mxu1 %v4628_v16  ;;  %v4659_v16 = vld [vmem:[#allocation11 + $0x150] ss:$8 sps:$4 sm:$0xff]  }
 0x961   :  { %4126 = vmatprep.subr.bf16.mxu1 %v4630_v18  ;;  %v4660_v18 = vld [vmem:[#allocation11 + $0x164] ss:$8 sps:$4 sm:$0xff]  }
 0x964   :  { %4128 = vmatpush1.bf16.msra.mxu1 %v4632_v25  ;;  %v4662_v25 = vld [vmem:[#allocation11 + $0x160] ss:$8 sps:$4 sm:$0xff]  }
 0x965   :  { %4130 = vmatprep.subr.bf16.mxu1 %v4634_v23  ;;  %v4663_v23 = vld [vmem:[#allocation11 + $0x174] ss:$8 sps:$4 sm:$0xff]  }
 0x968   :  { %4132 = vmatpush1.bf16.msra.mxu1 %v4636_v19  ;;  %v4665_v19 = vld [vmem:[#allocation11 + $0x170] ss:$8 sps:$4 sm:$0xff]  }
 0x969   :  { %4134 = vmatprep.subr.bf16.mxu1 %v4638_v59  ;;  %v3006_v59 = vld [vmem:[#allocation17] sm:$0xff]  }
 0x96c   :  { %4136 = vmatpush1.bf16.msra.mxu1 %v4640_v60  ;;  %v3089_v60 = vld [vmem:[#allocation17 + $0x8] sm:$0xff]  }
 0x96d   :  { %4170 = vmatprep.subr.bf16.mxu1 %v4642_v62  ;;  %v3091_v62 = vld [vmem:[#allocation17 + $0x18] sm:$0xff]  }
 0xa22   :  { %v3557_v30 = vpop.f32.mrb[10].mxu1 }
 0xa23   :  { %v4307_v34 = vadd.f32 %v3557_v30, %v1365_v27  ;;  %v1768_v35 = vpop.f32.mrb[11].mxu1  ;;  %v3082_v30 = vld [vmem:[#allocation16 + $0x8] sm:$0xff]  }
 0xa24   :  { %v4308_v38 = vadd.f32 %v1768_v35, %v1365_v27  ;;  %v3079_v27 = vld [vmem:[#allocation13 + $0xa8] sm:$0xff]   ;;  %v5475_v35 = vld [vmem:[%s5525_s8 + $0x6] sm:$0x7]  ;;  %s5017_s8 = smov [#allocation20]  }
 0xa25   :  { %4694 = vtanh.f32 %v4307_v34  ;;  %v3083_v34 = vld [vmem:[#allocation16 + $0x10] sm:$0xff]   ;;  %v2006_v36 = vrot.slane %v5475_v35, %v5347_v53  ;;  %s2708_s10 = sshll.u32 %s5017_s8, 4  ;;  %s2709_s10 = int_to_ptr.vmem [resolvable:$true] %s2708_s10 }
 0xa26   :  { %4696 = vtanh.f32 %v4308_v38  ;;  %s4938_s27 = scalar_lea.vmem %s2709_s10, 768  ;;  %p4943_p11 = scmp.lt.s32.totalorder %s2709_s10, %s2709_s10 }
 0xa27   :  { %p4939_p10 = scmp.ne.s32.totalorder %s2709_s10, %s4938_s27  ;;  %p4944_p12 = scmp.lt.s32.totalorder %s4938_s27, %s4938_s27 }
 0xa29   :  { %p4945_p13 = por %p4944_p12, %p4943_p11 }
 0xa2b   :  { %p4946_p0 = pnand %p4945_p13, %p4939_p10 }
 0xa2f   :  { %v4695_v47 = vpop.eup %4694 }
 0xa30   :  { %v4697_v48 = vpop.eup %4696  ;;  %v1786_v50 = vmul.f32 %v4695_v47, %v1656_v42 }
 0xa31   :  { %v1785_v51 = vmul.f32 %v4697_v48, %v1655_v43 }
 0xa32   :  { %v1788_v55 = vadd.f32 %v1786_v50, %v1784_v49 }
 0xa33   :  { %v1787_v56 = vadd.f32 %v1785_v51, %v1783_v46 }
 0xa34   :  { %1791 = vst [vmem:[#allocation20 + $0x18] sm:$0xff] %v1788_v55 }
 0xa35   :  { %1790 = vst [vmem:[#allocation20 + $0x10] sm:$0xff] %v1787_v56  ;;  %3590 = vmatprep.mubr.f32.mxu0 %v1787_v56 }
 0xa36   :  { %3591 = vmatmul.mubr.f32.vlgmr.msra.gmra.mrb[10].mxu0 %v1788_v55 }
 0xa37   :  { %4140 = vmatpush3.bf16.msra.mxu0 %v4613_v7 }
 0xa38   :  { %4142 = vmatprep.subr.bf16.mxu0 %v4617_v52 }
 0xa3b   :  { %4144 = vmatpush3.bf16.msra.mxu0 %v4617_v52 }
 0xa3c   :  { %4146 = vmatprep.subr.bf16.mxu0 %v4621_v57 }
 0xa3f   :  { %4148 = vmatpush3.bf16.msra.mxu0 %v4621_v57  ;;  %v3084_v57 = vld [vmem:[#allocation16 + $0x18] sm:$0xff]  }
 0xa40   :  { %4150 = vmatprep.subr.bf16.mxu0 %v4625_v58 }
 0xa43   :  { %4152 = vmatpush3.bf16.msra.mxu0 %v4625_v58  ;;  %v3085_v58 = vld [vmem:[#allocation16 + $0x20] sm:$0xff]  }
 0xa44   :  { %4154 = vmatprep.subr.bf16.mxu0 %v4629_v33 }
 0xa47   :  { %4156 = vmatpush3.bf16.msra.mxu0 %v4629_v33  ;;  %v3086_v33 = vld [vmem:[#allocation16 + $0x28] sm:$0xff]  }
 0xa48   :  { %4158 = vmatprep.subr.bf16.mxu0 %v4633_v32 }
 0xa4b   :  { %4160 = vmatpush3.bf16.msra.mxu0 %v4633_v32  ;;  %v3087_v32 = vld [vmem:[#allocation16 + $0x30] sm:$0xff]  }
 0xa4c   :  { %4162 = vmatprep.subr.bf16.mxu0 %v4637_v54 }
 0xa4f   :  { %4164 = vmatpush3.bf16.msra.mxu0 %v4637_v54  ;;  %v3088_v54 = vld [vmem:[#allocation16 + $0x38] sm:$0xff]  }
 0xa50   :  { %4166 = vmatprep.subr.bf16.mxu0 %v4641_v61 }
 0xa53   :  { %4168 = vmatpush3.bf16.msra.mxu0 %v4641_v61  ;;  %v3090_v61 = vld [vmem:[#allocation17 + $0x10] sm:$0xff]  }
 0xa54   :  { %4202 = vmatprep.subr.bf16.mxu0 %v2942_v63 }
 0xb09   :  { %v3592_v0 = vpop.f32.mrb[10].mxu0 }
 0xb0a   :  { %v1901_v41 = vadd.f32 %v3592_v0, %v5400_v10  ;;  %v1891_v1 = vpop.f32.mrb[11].mxu0  ;;  %v4650_v10 = vld [vmem:[#allocation11 + $0x120] ss:$8 sps:$4 sm:$0xff]  }
 0xb0b   :  { %v1900_v3 = vadd.f32 %v1891_v1, %v5398_v15  ;;  %v4651_v15 = vld [vmem:[#allocation11 + $0x134] ss:$8 sps:$4 sm:$0xff]   ;;  %v3093_v0 = vld [vmem:[#allocation17 + $0x28] sm:$0xff]  }
 0xb0c   :  { %v1911_v7 = vadd.f32 %v2761_v40, %v1901_v41  ;;  %v3094_v41 = vld [vmem:[#allocation17 + $0x30] sm:$0xff]  }
 0xb0d   :  { %v1910_v5 = vadd.f32 %v2761_v40, %v1900_v3  ;;  %v2002_v40 = vrot.slane %v5475_v35, %v5382_v31 }
 0xb0f   :  { %2079 = vmatmul.mubr.f32.vlgmr.msra.gmra.mrb[12].mxu1 %v1910_v5  ;;  %3625 = vmatprep.mubr.f32.mxu0 %v1910_v5 }
 0xb10   :  { %4172 = vmatpush1.bf16.msra.mxu1 %v4644_v4  ;;  %3626 = vmatmul.mubr.f32.vlgmr.msra.gmra.mrb[12].mxu0 %v1911_v7 }
 0xb11   :  { %2084 = vmatprep.mubr.f32.mxu1 %v5016_v17  ;;  %4174 = vmatprep.subr.bf16.mxu1 %v4645_v6  ;;  %v2010_v6 = vrot.slane %v5475_v35, %v5389_v37 }
 0xb12   :  { %4204 = vmatpush3.bf16.msra.mxu0 %v2942_v63  ;;  %v3092_v63 = vld [vmem:[#allocation17 + $0x20] sm:$0xff]  }
 0xb13   :  { %2085 = vmatmul.mubr.f32.gmra.mrb[14].mxu1 %v1911_v7  ;;  %4206 = vmatprep.subr.bf16.mxu0 %v3075_v9 }
 0xb14   :  { %4176 = vmatpush1.bf16.msra.mxu1 %v4647_v8  ;;  %2279 = vmatprep.mubr.f32.mxu1 %v5016_v17 }
 0xb15   :  { %4178 = vmatprep.subr.bf16.mxu1 %v4648_v11 }
 0xb16   :  { %4208 = vmatpush3.bf16.msra.mxu0 %v3075_v9 }
 0xb17   :  { %4210 = vmatprep.subr.bf16.mxu0 %v3076_v22 }
 0xb18   :  { %4180 = vmatpush1.bf16.msra.mxu1 %v4650_v10 }
 0xb19   :  { %4182 = vmatprep.subr.bf16.mxu1 %v4651_v15 }
 0xb1a   :  { %4212 = vmatpush3.bf16.msra.mxu0 %v3076_v22 }
 0xb1b   :  { %4214 = vmatprep.subr.bf16.mxu0 %v3077_v24 }
 0xb1c   :  { %4184 = vmatpush1.bf16.msra.mxu1 %v4653_v12 }
 0xb1d   :  { %4186 = vmatprep.subr.bf16.mxu1 %v4654_v13 }
 0xb1e   :  { %4216 = vmatpush3.bf16.msra.mxu0 %v3077_v24 }
 0xb1f   :  { %4218 = vmatprep.subr.bf16.mxu0 %v3078_v26 }
 0xb20   :  { %4188 = vmatpush1.bf16.msra.mxu1 %v4656_v14 }
 0xb21   :  { %4190 = vmatprep.subr.bf16.mxu1 %v4657_v2 }
 0xb22   :  { %4220 = vmatpush3.bf16.msra.mxu0 %v3078_v26 }
 0xb23   :  { %4222 = vmatprep.subr.bf16.mxu0 %v3079_v27 }
 0xb24   :  { %4192 = vmatpush1.bf16.msra.mxu1 %v4659_v16 }
 0xb25   :  { %4194 = vmatprep.subr.bf16.mxu1 %v4660_v18 }
 0xb26   :  { %4224 = vmatpush3.bf16.msra.mxu0 %v3079_v27  ;;  %v3095_v27 = vld [vmem:[#allocation17 + $0x38] sm:$0xff]  }
 0xb27   :  { %4226 = vmatprep.subr.bf16.mxu0 %v3080_v28 }
 0xb28   :  { %4196 = vmatpush1.bf16.msra.mxu1 %v4662_v25 }
 0xb29   :  { %4198 = vmatprep.subr.bf16.mxu1 %v4663_v23 }
 0xb2a   :  { %4228 = vmatpush3.bf16.msra.mxu0 %v3080_v28  ;;  %v2763_v28 = vld [vmem:[#allocation7 + $0x3] ss:$0 sm:$0xff] }
 0xb2c   :  { %4200 = vmatpush1.bf16.msra.mxu1 %v4665_v19 }
 0xb2d   :  { %4234 = vmatprep.subr.bf16.mxu1 %v2974_v29 }
 0xb2f   :  { %2280 = vmatmul.mubr.f32.vlgmr.msra.gmra.mrb[12].mxu1 %v5465_v20 }
 0xb30   :  { %2285 = vmatprep.mubr.f32.mxu1 %v5016_v17  ;;  %v3081_v17 = vld [vmem:[#allocation13 + $0xb8] sm:$0xff]   ;;  %4236 = vmatpush3.bf16.msra.mxu1 %v2974_v29 }
 0xb31   :  { %4230 = vmatprep.subr.bf16.mxu0 %v3081_v17  ;;  %4238 = vmatprep.subr.bf16.mxu1 %v3082_v30 }
 0xb32   :  { %4232 = vmatpush3.bf16.msra.mxu0 %v3081_v17 }
 0xb33   :  { %2286 = vmatmul.mubr.f32.gmra.mrb[14].mxu1 %v5469_v21  ;;  %4266 = vmatprep.subr.bf16.mxu0 %v3006_v59 }
 0xb34   :  { %4240 = vmatpush3.bf16.msra.mxu1 %v3082_v30 }
 0xb35   :  { %4242 = vmatprep.subr.bf16.mxu1 %v3083_v34 }
 0xb38   :  { %4244 = vmatpush3.bf16.msra.mxu1 %v3083_v34 }
 0xb39   :  { %4246 = vmatprep.subr.bf16.mxu1 %v3084_v57 }
 0xb3c   :  { %4248 = vmatpush3.bf16.msra.mxu1 %v3084_v57 }
 0xb3d   :  { %4250 = vmatprep.subr.bf16.mxu1 %v3085_v58 }
 0xb40   :  { %4252 = vmatpush3.bf16.msra.mxu1 %v3085_v58 }
 0xb41   :  { %4254 = vmatprep.subr.bf16.mxu1 %v3086_v33 }
 0xb44   :  { %4256 = vmatpush3.bf16.msra.mxu1 %v3086_v33 }
 0xb45   :  { %4258 = vmatprep.subr.bf16.mxu1 %v3087_v32 }
 0xb48   :  { %4260 = vmatpush3.bf16.msra.mxu1 %v3087_v32 }
 0xb49   :  { %4262 = vmatprep.subr.bf16.mxu1 %v3088_v54 }
 0xb4c   :  { %4264 = vmatpush3.bf16.msra.mxu1 %v3088_v54 }
 0xc02   :  { %v2281_v38 = vpop.f32.mrb[12].mxu1 }
 0xc03   :  { %v2283_v39 = vpop.f32.mrb[13].mxu1  ;;  %v4309_v3 = vadd.f32 %v2281_v38, %v2002_v40 }
 0xc04   :  { %v4310_v42 = vadd.f32 %v2283_v39, %v2006_v36 }
 0xc05   :  { %v2294_v5 = vmul.f32 0.5, %v4309_v3 }
 0xc06   :  { %v2304_v43 = vmul.f32 0.5, %v4310_v42  ;;  %v2287_v44 = vpop.f32.mrb[14].mxu1 }
 0xc07   :  { %v2289_v45 = vpop.f32.mrb[15].mxu1  ;;  %v4311_v1 = vadd.f32 %v2287_v44, %v2002_v40 }
 0xc08   :  { %4698 = vtanh.f32 %v2304_v43  ;;  %v4312_v47 = vadd.f32 %v2289_v45, %v2006_v36 }
 0xc09   :  { %v2295_v4 = vmul.f32 0.5, %v4311_v1 }
 0xc0a   :  { %v2305_v48 = vmul.f32 0.5, %v4312_v47 }
 0xc0c   :  { %4700 = vtanh.f32 %v2305_v48 }
 0xc0d   :  { %4702 = vtanh.f32 %v2295_v4 }
 0xc0e   :  { %4704 = vtanh.f32 %v2294_v5 }
 0xc12   :  { %v4699_v49 = vpop.eup %4698 }
 0xc13   :  { %v2308_v50 = vmul.f32 0.5, %v4699_v49 }
 0xc15   :  { %v2310_v46 = vadd.f32 0.5, %v2308_v50 }
 0xc16   :  { %v4701_v51 = vpop.eup %4700 }
 0xc17   :  { %v2309_v55 = vmul.f32 0.5, %v4701_v51  ;;  %v2312_v56 = vmul.f32 %v2310_v46, %v5465_v20  ;;  %v4703_v7 = vpop.eup %4702 }
 0xc18   :  { %v4705_v8 = vpop.eup %4704  ;;  %v2299_v15 = vmul.f32 0.5, %v4703_v7 }
 0xc19   :  { %v2311_v52 = vadd.f32 0.5, %v2309_v55  ;;  %3660 = vmatprep.mubr.f32.mxu0 %v2312_v56  ;;  %v2298_v13 = vmul.f32 0.5, %v4705_v8 }
 0xc1a   :  { %v2301_v31 = vadd.f32 0.5, %v2299_v15 }
 0xc1b   :  { %v2313_v53 = vmul.f32 %v2311_v52, %v5469_v21  ;;  %v2300_v14 = vadd.f32 0.5, %v2298_v13 }
 0xc1c   :  { %v2427_v2 = vsub.f32 1.0, %v2301_v31 }
 0xc1d   :  { %3661 = vmatmul.mubr.f32.vlgmr.msra.gmra.mrb[12].mxu0 %v2313_v53  ;;  %v2426_v16 = vsub.f32 1.0, %v2300_v14 }
 0xc1e   :  { %4268 = vmatpush3.bf16.msra.mxu0 %v3006_v59  ;;  %v2429_v23 = vmul.f32 %v2427_v2, %v5469_v21 }
 0xc1f   :  { %4270 = vmatprep.subr.bf16.mxu0 %v3089_v60  ;;  %v2428_v37 = vmul.f32 %v2426_v16, %v5465_v20  ;;  %v2764_v20 = vld [vmem:[#allocation7 + $0x4] ss:$0 sm:$0xff] }
 0xc22   :  { %4272 = vmatpush3.bf16.msra.mxu0 %v3089_v60 }
 0xc23   :  { %4274 = vmatprep.subr.bf16.mxu0 %v3090_v61 }
 0xc26   :  { %4276 = vmatpush3.bf16.msra.mxu0 %v3090_v61 }
 0xc27   :  { %4278 = vmatprep.subr.bf16.mxu0 %v3091_v62 }
 0xc2a   :  { %4280 = vmatpush3.bf16.msra.mxu0 %v3091_v62 }
 0xc2b   :  { %4282 = vmatprep.subr.bf16.mxu0 %v3092_v63 }
 0xc2e   :  { %4284 = vmatpush3.bf16.msra.mxu0 %v3092_v63 }
 0xc2f   :  { %4286 = vmatprep.subr.bf16.mxu0 %v3093_v0 }
 0xc32   :  { %4288 = vmatpush3.bf16.msra.mxu0 %v3093_v0 }
 0xc33   :  { %4290 = vmatprep.subr.bf16.mxu0 %v3094_v41 }
 0xc36   :  { %4292 = vmatpush3.bf16.msra.mxu0 %v3094_v41 }
 0xc37   :  { %4294 = vmatprep.subr.bf16.mxu0 %v3095_v27 }
 0xc3a   :  { %4296 = vmatpush3.bf16.msra.mxu0 %v3095_v27 }
 0xcf0   :  { %v3662_v9 = vpop.f32.mrb[12].mxu0 }
 0xcf1   :  { %v4313_v11 = vadd.f32 %v3662_v9, %v2010_v6  ;;  %v2413_v10 = vpop.f32.mrb[13].mxu0 }
 0xcf2   :  { %v4314_v12 = vadd.f32 %v2413_v10, %v2010_v6 }
 0xcf3   :  { %4706 = vtanh.f32 %v4313_v11 }
 0xcf4   :  { %4708 = vtanh.f32 %v4314_v12 }
 0xcfd   :  { %v4707_v18 = vpop.eup %4706 }
 0xcfe   :  { %v4709_v25 = vpop.eup %4708  ;;  %v2431_v19 = vmul.f32 %v4707_v18, %v2301_v31 }
 0xcff   :  { %v2430_v22 = vmul.f32 %v4709_v25, %v2300_v14 }
 0xd00   :  { %v2433_v24 = vadd.f32 %v2431_v19, %v2429_v23 }
 0xd01   :  { %v2432_v26 = vadd.f32 %v2430_v22, %v2428_v37 }
 0xd02   :  { %2436 = vst [vmem:[#allocation20 + $0x28] sm:$0xff] %v2433_v24 }
 0xd03   :  { %2435 = vst [vmem:[#allocation20 + $0x20] sm:$0xff] %v2432_v26  ;;  %3695 = vmatprep.mubr.f32.mxu1 %v2432_v26 }
 0xd04   :  { %3696 = vmatmul.mubr.f32.vlgmr.msra.gmra.mrb[16].mxu1 %v2433_v24 }
 0xdd7   :  { %v3697_v17 = vpop.f32.mrb[16].mxu1 }
 0xdd8   :  { %v2548_v29 = vadd.f32 %v3697_v17, %v2763_v28  ;;  %v2542_v30 = vpop.f32.mrb[17].mxu1 }
 0xdd9   :  { %v2543_v34 = vadd.f32 %v2763_v28, %v2542_v30 }
 0xdda   :  { %v2552_v21 = vmax.f32 %v2548_v29, 0.0 }
 0xddb   :  { %v2551_v35 = vmax.f32 %v2543_v34, 0.0 }
 0xddd   :  { %3730 = vmatprep.mubr.f32.mxu0 %v2551_v35 }
 0xdde   :  { %3731 = vmatmul.mubr.f32.vlgmr.msra.gmra.mrb[14].mxu0 %v2552_v21 }
 0xeb1   :  { %v3732_v36 = vpop.f32.mrb[14].mxu0 }
 0xeb2   :  { %v2664_v38 = vadd.f32 %v3732_v36, %v2764_v20  ;;  %v2658_v39 = vpop.f32.mrb[15].mxu0 }
 0xeb3   :  { %v2659_v42 = vadd.f32 %v2764_v20, %v2658_v39 }
 0xeb4   :  { %2669 = vmax.xlane.f32.xlu1 %v2664_v38 }
 0xeb5   :  { %2667 = vmax.xlane.f32.xlu0 %v2659_v42 }
 0xf41   :  { %v2670_v43 = vpop.xlane.xlu1 %2669 }
 0xf42   :  { %v2672_v44 = vsub.f32 %v2664_v38, %v2670_v43  ;;  %v2668_v45 = vpop.xlane.xlu0 %2667 }
 0xf43   :  { %v2671_v47 = vsub.f32 %v2659_v42, %v2668_v45 }
 0xf44   :  { %v2675_v48 = vmul.f32 1.442695, %v2672_v44 }
 0xf45   :  { %v2673_v49 = vmul.f32 1.442695, %v2671_v47 }
 0xf46   :  { %4710 = vpow2.f32 %v2675_v48 }
 0xf47   :  { %4712 = vpow2.f32 %v2673_v49 }
 0xf50   :  { %v4711_v50 = vpop.eup %4710 }
 0xf51   :  { %v4713_v46 = vpop.eup %4712  ;;  %2679 = vadd.xlane.f32.xlu1 %v4711_v50 }
 0xf52   :  { %2677 = vadd.xlane.f32.xlu0 %v4713_v46 }
 0xf53   :  { %4949 = shalt.err (!%p4946_p0)
}
 0xf54   :  { %s4950_s26 = scalar_lea.hbm %s5533_s16, 768 }
 0xf55   :  { %p4951_p1 = scmp.ne.s32.totalorder %s5533_s16, %s4950_s26  ;;  %p4954_p2 = scmp.lt.u32.totalorder %s4950_s26, %s5533_s16 }
 0xf57   :  { %p4956_p3 = pnand %p4954_p2, %p4951_p1 }
 0xf59   :  { %4959 = shalt.err (!%p4956_p3)
}
 0xf5a   :  { %2714 = dma.vmem_to_hbm [thread:$0]  %s2709_s10, 768, %s5533_s16, [#allocation21], %s5547_s17, %s5547_s17, %s5546_s24  }
 0xf5b   :  { %s5018_s22 = smov [#allocation19]  }
 0xf5c   :  { %s2696_s3 = sshll.u32 %s5018_s22, 4  ;;  %s2697_s3 = int_to_ptr.vmem [resolvable:$true] %s2696_s3 }
 0xf5d   :  { %s4960_s18 = scalar_lea.vmem %s2697_s3, 256  ;;  %p4965_p5 = scmp.lt.s32.totalorder %s2697_s3, %s2697_s3 }
 0xf5e   :  { %p4961_p4 = scmp.ne.s32.totalorder %s2697_s3, %s4960_s18  ;;  %p4966_p6 = scmp.lt.s32.totalorder %s4960_s18, %s4960_s18 }
 0xf60   :  { %p4967_p7 = por %p4966_p6, %p4965_p5 }
 0xf62   :  { %p4968_p8 = pnand %p4967_p7, %p4961_p4 }
 0xfde   :  { %v2680_v51 = vpop.xlane.xlu1 %2679 }
 0xfdf   :  { %4714 = vlog2.f32 %v2680_v51  ;;  %v2678_v55 = vpop.xlane.xlu0 %2677 }
 0xfe0   :  { %4716 = vlog2.f32 %v2678_v55 }
 0xfe9   :  { %v4715_v56 = vpop.eup %4714 }
 0xfea   :  { %v4717_v52 = vpop.eup %4716  ;;  %v2684_v53 = vmul.f32 0.6931472, %v4715_v56 }
 0xfeb   :  { %v2682_v57 = vmul.f32 0.6931472, %v4717_v52 }
 0xfec   :  { %v2686_v58 = vadd.f32 %v2684_v53, %v2670_v43 }
 0xfed   :  { %v2685_v33 = vadd.f32 %v2682_v57, %v2668_v45 }
 0xfee   :  { %v2688_v32 = vsub.f32 %v2664_v38, %v2686_v58 }
 0xfef   :  { %v2687_v54 = vsub.f32 %v2659_v42, %v2685_v33 }
 0xff0   :  { %2690 = vst [vmem:[#allocation19 + $0x8] sm:$0xff] %v2688_v32 }
 0xff1   :  { %2689 = vst [vmem:[#allocation19] sm:$0xff] %v2687_v54 }
 0xff2   :  { %4971 = shalt.err (!%p4968_p8)
}
 0xff3   :  { %s5551_s1 = sld [smem:[#allocation31_spill]] }
 0xff9   :  { %s4972_s25 = scalar_lea.hbm %s5551_s1, 256 }
 0xffa   :  { %p4973_p9 = scmp.ne.s32.totalorder %s5551_s1, %s4972_s25  ;;  %p4976_p10 = scmp.lt.u32.totalorder %s4972_s25, %s5551_s1 }
 0xffc   :  { %p4978_p11 = pnand %p4976_p10, %p4973_p9 }
 0xffe   :  { %4981 = shalt.err (!%p4978_p11)
}
 0xfff   :  { %2702 = dma.vmem_to_hbm [thread:$0]  %s2697_s3, 256, %s5551_s1, [#allocation4], %s5547_s17, %s5547_s17, %s5546_s24  }
0x1000   :  { %4994 = dma.done.wait [#allocation4], 256  }
0x1001   :  { %4995 = vsyncadd [#allocation4], 4294967040 }
0x1002   :  { %4996 = dma.done.wait [#allocation21], 768  }
0x1003   :  { %4997 = vsyncadd [#allocation21], 4294966528 }
0x1004   :  { %2721 = vsyncpa [#allocation3], 1 }
0x1005   :  { %2722 = vsyncpa [#allocation6], 1 }
0x1006   :  { %2723 = vsyncpa [#allocation9], 1 }
0x1007   :  { %2724 = vsyncpa [#allocation12], 1 }
0x1008   :  { %2725 = vsyncpa [#allocation15], 1 }
0x1009   :  { %2726 = vsyncpa [#allocation18], 1 }
0x100a   :  { %2727 = vsyncpa [#allocation4], 1 }
0x100b   :  { %2728 = vsyncpa [#allocation21], 1 }

</bundles_post_ra>
